<compile_context>
chip_gen: v7x
topology: tpu7x:2x2x1
jax: 0.10.0
libtpu: 0.0.40
codegen_flags: <defaults>
</compile_context>

<pallas_src>
from functools import partial

import jax
import jax.numpy as jnp
import numpy as np
from jax.experimental import pallas as pl
from jax.experimental.pallas import tpu as pltpu


# ----------------------------- fused block kernel ---------------------------

def _make_block_kernel(H, W, Cin, Cout, stride, equal_in_out, bt):
    """Builds the fused kernel.  Static specialization on (stride, equal_in_out, bt)."""
    H2 = (H - 1) // stride + 1
    W2 = (W - 1) // stride + 1
    M = bt * H2 * W2
    f32, bf16 = jnp.float32, jnp.bfloat16

    def kernel(*refs):
        if equal_in_out:
            (x_ref, s1_ref, b1_ref, w1_ref, s2_ref, b2_ref, w2_ref,
             o_ref, *scratch) = refs
            wsc_ref = None
        else:
            (x_ref, s1_ref, b1_ref, w1_ref, s2_ref, b2_ref, w2_ref, wsc_ref,
             o_ref, *scratch) = refs
        if stride == 1:
            pad1, pad2 = scratch
        else:
            padA, padB, pad2 = scratch

        # ---- bn1 + relu (f32) --------------------------------------------
        # stride==1: x is (bt, H, W, Cin);  stride==2: (bt, H, W/2, 2*Cin)
        # with column pairs packed into channels ([even col | odd col]).
        x = x_ref[...]
        a1 = jnp.maximum(x * s1_ref[...] + b1_ref[...], 0.0)

        # ---- conv1 halo scratch: zero 1px border, write interior ----------
        if stride == 1:
            zr = jnp.zeros((bt, 1, W + 2, Cin), f32)
            zc = jnp.zeros((bt, H, 1, Cin), f32)
            pad1[:, 0:1, :, :] = zr
            pad1[:, H + 1:H + 2, :, :] = zr
            pad1[:, 1:H + 1, 0:1, :] = zc
            pad1[:, 1:H + 1, W + 1:W + 2, :] = zc
            pad1[:, 1:H + 1, 1:W + 1, :] = a1
        else:
            # padA pair p holds padded col 2p   (left pad / odd data cols)
            # padB pair p holds padded col 2p+1 (even data cols / right pad)
            zr = jnp.zeros((bt, 1, W2 + 1, Cin), f32)
            zc = jnp.zeros((bt, H, 1, Cin), f32)
            padA[:, 0:1, :, :] = zr
            padA[:, H + 1:H + 2, :, :] = zr
            padA[:, 1:H + 1, 0:1, :] = zc                       # left pad col
            padA[:, 1:H + 1, 1:W2 + 1, :] = a1[:, :, :, Cin:2 * Cin]
            padB[:, 0:1, :, :] = zr
            padB[:, H + 1:H + 2, :, :] = zr
            padB[:, 1:H + 1, W2:W2 + 1, :] = zc                 # right pad col
            padB[:, 1:H + 1, 0:W2, :] = a1[:, :, :, 0:Cin]

        # ---- conv1: 3x3 stride s -> 9 accumulated per-tap MXU matmuls -----
        acc1 = jnp.zeros((M, Cout), f32)
        if stride == 1:
            for ky in range(3):
                for kx in range(3):
                    p = pad1[:, ky:ky + H, kx:kx + W, :]
                    acc1 = acc1 + jnp.dot(
                        p.reshape(M, Cin).astype(bf16), w1_ref[ky * 3 + kx],
                        preferred_element_type=f32)
        else:
            # Split padded rows by parity on the (untiled) leading axis.
            A = padA[...].reshape(bt, H2 + 1, 2, W2 + 1, Cin)
            B = padB[...].reshape(bt, H2 + 1, 2, W2 + 1, Cin)
            for ky in range(3):
                if ky == 0:            # padded rows 2*oy
                    Ar, Br = A[:, 0:H2, 0], B[:, 0:H2, 0]
                elif ky == 1:          # padded rows 2*oy + 1
                    Ar, Br = A[:, 0:H2, 1], B[:, 0:H2, 1]
                else:                  # padded rows 2*oy + 2
                    Ar, Br = A[:, 1:H2 + 1, 0], B[:, 1:H2 + 1, 0]
                taps = (Ar[:, :, 0:W2, :],        # kx=0 -> padded col 2*ox
                        Br[:, :, 0:W2, :],        # kx=1 -> padded col 2*ox+1
                        Ar[:, :, 1:W2 + 1, :])    # kx=2 -> padded col 2*ox+2
                for kx in range(3):
                    acc1 = acc1 + jnp.dot(
                        taps[kx].reshape(M, Cin).astype(bf16),
                        w1_ref[ky * 3 + kx], preferred_element_type=f32)

        # ---- bn2 + relu written straight into the conv2 halo scratch ------
        zr2 = jnp.zeros((bt, 1, W2 + 2, Cout), f32)
        zc2 = jnp.zeros((bt, H2, 1, Cout), f32)
        pad2[:, 0:1, :, :] = zr2
        pad2[:, H2 + 1:H2 + 2, :, :] = zr2
        pad2[:, 1:H2 + 1, 0:1, :] = zc2
        pad2[:, 1:H2 + 1, W2 + 1:W2 + 2, :] = zc2
        pad2[:, 1:H2 + 1, 1:W2 + 1, :] = jnp.maximum(
            acc1 * s2_ref[...] + b2_ref[...], 0.0).reshape(bt, H2, W2, Cout)

        # ---- conv2: 3x3 stride 1 -> 9 accumulated per-tap matmuls ---------
        acc2 = jnp.zeros((M, Cout), f32)
        for ky in range(3):
            for kx in range(3):
                p = pad2[:, ky:ky + H2, kx:kx + W2, :]
                acc2 = acc2 + jnp.dot(
                    p.reshape(M, Cout).astype(bf16), w2_ref[ky * 3 + kx],
                    preferred_element_type=f32)

        # ---- shortcut ------------------------------------------------------
        if equal_in_out:
            res = x.reshape(M, Cout)                  # identity (f32), stride 1
        else:
            if stride == 2:
                # 1x1 stride-2 conv input = even rows / even cols of relu(bn1(x))
                a1s = a1.reshape(bt, H2, 2, W2, 2 * Cin)[:, :, 0, :, 0:Cin]
            else:
                a1s = a1
            res = jnp.dot(a1s.reshape(M, Cin).astype(bf16), wsc_ref[...],
                          preferred_element_type=f32)

        o_ref[...] = (acc2 + res).reshape(bt, H2, W2, Cout).astype(o_ref.dtype)

    return kernel, H2, W2


# ------------------------------ helpers --------------------------------------

def _pick_batch_tile(N, H2, W2, target_rows=256):
    """Largest divisor of N with bt*H2*W2 <= max(target_rows, H2*W2)."""
    bt = 1
    for cand in range(1, N + 1):
        if N % cand == 0 and cand * H2 * W2 <= max(target_rows, H2 * W2):
            bt = cand
    return bt


def _vmem_budget_bytes(bt, H, Wk, Ck, H2, W2, Cin, Cout, stride, equal_in_out):
    f32b, bf16b = 4, 2
    x_blk = bt * H * Wk * Ck * f32b
    o_blk = bt * H2 * W2 * Cout * f32b
    w = (9 * Cin * Cout + 9 * Cout * Cout) * bf16b
    if not equal_in_out:
        w += Cin * Cout * bf16b
    scales = 2 * Ck * f32b + 2 * Cout * f32b
    if stride == 1:
        pads = bt * ((H + 2) * (Wk + 2) * Cin + (H2 + 2) * (W2 + 2) * Cout) * f32b
    else:
        pads = bt * (2 * (H + 2) * (W2 + 1) * Cin + (H2 + 2) * (W2 + 2) * Cout) * f32b
    live = x_blk + 2 * bt * H2 * W2 * Cout * f32b + bt * H * Wk * Ck * f32b
    total = 2 * (x_blk + o_blk + w + scales) + pads + live   # x2: double-buffered I/O
    return int(min(max(2 * total + (8 << 20), 32 << 20), 100 << 20))


# ------------------------------ Block forward --------------------------------

@partial(jax.jit, static_argnames=("stride", "equal_in_out"))
def block_forward(x_nchw, params, stride, equal_in_out):
    """Pallas implementation of Block.forward.  Input/output are NCHW."""
    assert stride in (1, 2), "WRN Block uses stride 1 or 2"
    if equal_in_out:
        assert stride == 1, "equal_in_out requires stride 1"
    N, Cin, H, W = x_nchw.shape
    w1 = params["conv1_w"]                       # (3, 3, Cin, Cout)  HWIO
    Cout = w1.shape[-1]

    # NCHW -> NHWC (PyTorch interface kept; see TODO at top).
    x = jnp.transpose(x_nchw, (0, 2, 3, 1)).astype(jnp.float32)

    s1 = params["bn1_scale"]
    b1 = params["bn1_bias"]
    if stride == 2:
        assert H % 2 == 0 and W % 2 == 0
        # Pack column pairs into channels: free row-major reshape in HBM.
        x_in = x.reshape(N, H, W // 2, 2 * Cin)
        s1 = jnp.tile(s1, 2)
        b1 = jnp.tile(b1, 2)
    else:
        x_in = x
    Ck = x_in.shape[-1]
    Wk = x_in.shape[2]

    H2 = (H - 1) // stride + 1
    W2 = (W - 1) // stride + 1
    bt = _pick_batch_tile(N, H2, W2)

    kernel, H2, W2 = _make_block_kernel(H, W, Cin, Cout, stride, equal_in_out, bt)

    # Weights in per-tap layout (tap t = ky*3 + kx), bf16.
    w1m = w1.reshape(9, Cin, Cout).astype(jnp.bfloat16)
    w2m = params["conv2_w"].reshape(9, Cout, Cout).astype(jnp.bfloat16)
    s1m = s1.reshape(1, 1, Ck).astype(jnp.float32)
    b1m = b1.reshape(1, 1, Ck).astype(jnp.float32)
    s2m = params["bn2_scale"].reshape(1, Cout).astype(jnp.float32)
    b2m = params["bn2_bias"].reshape(1, Cout).astype(jnp.float32)

    in_specs = [
        pl.BlockSpec((bt, H, Wk, Ck), lambda n: (n, 0, 0, 0)),
        pl.BlockSpec((1, 1, Ck), lambda n: (0, 0, 0)),
        pl.BlockSpec((1, 1, Ck), lambda n: (0, 0, 0)),
        pl.BlockSpec((9, Cin, Cout), lambda n: (0, 0, 0)),
        pl.BlockSpec((1, Cout), lambda n: (0, 0)),
        pl.BlockSpec((1, Cout), lambda n: (0, 0)),
        pl.BlockSpec((9, Cout, Cout), lambda n: (0, 0, 0)),
    ]
    args = [x_in, s1m, b1m, w1m, s2m, b2m, w2m]
    if not equal_in_out:
        in_specs.append(pl.BlockSpec((Cin, Cout), lambda n: (0, 0)))
        args.append(params["convsc_w"].astype(jnp.bfloat16))

    if stride == 2:
        scratch = [pltpu.VMEM((bt, H + 2, W2 + 1, Cin), jnp.float32),
                   pltpu.VMEM((bt, H + 2, W2 + 1, Cin), jnp.float32),
                   pltpu.VMEM((bt, H2 + 2, W2 + 2, Cout), jnp.float32)]
    else:
        scratch = [pltpu.VMEM((bt, H + 2, W + 2, Cin), jnp.float32),
                   pltpu.VMEM((bt, H2 + 2, W2 + 2, Cout), jnp.float32)]

    vmem_limit = _vmem_budget_bytes(bt, H, Wk, Ck, H2, W2, Cin, Cout,
                                    stride, equal_in_out)

    out = pl.pallas_call(
        kernel,
        out_shape=jax.ShapeDtypeStruct((N, H2, W2, Cout), jnp.float32),
        grid=(N // bt,),
        in_specs=in_specs,
        out_specs=pl.BlockSpec((bt, H2, W2, Cout), lambda n: (n, 0, 0, 0)),
        scratch_shapes=scratch,
        compiler_params=pltpu.CompilerParams(
            dimension_semantics=("parallel",),
            vmem_limit_bytes=vmem_limit),
    )(*args)

    return jnp.transpose(out, (0, 3, 1, 2))      # back to NCHW


# --------------------------- params / reference ------------------------------

def fold_bn(gamma, beta, mean, var, eps=1e-5):
    scale = gamma / jnp.sqrt(var + eps)
    bias = beta - mean * scale
    return scale, bias


def init_params(key, cin, cout, equal_in_out):
    ks = list(jax.random.split(key, 11))
    p = {}

    def bn(c, i):
        g = 1.0 + 0.1 * jax.random.normal(ks[i], (c,), jnp.float32)
        b = 0.1 * jax.random.normal(ks[i + 1], (c,), jnp.float32)
        m = 0.1 * jax.random.normal(ks[i + 2], (c,), jnp.float32)
        v = jax.random.uniform(ks[i + 3], (c,), jnp.float32, 0.5, 1.5)
        return fold_bn(g, b, m, v)

    p["bn1_scale"], p["bn1_bias"] = bn(cin, 0)
    p["bn2_scale"], p["bn2_bias"] = bn(cout, 4)

    w1 = 0.1 * jax.random.normal(ks[8], (cout, cin, 3, 3), jnp.float32)    # OIHW
    w2 = 0.1 * jax.random.normal(ks[9], (cout, cout, 3, 3), jnp.float32)   # OIHW
    p["conv1_w_oihw"], p["conv2_w_oihw"] = w1, w2
    p["conv1_w"] = jnp.transpose(w1, (2, 3, 1, 0))   # HWIO
    p["conv2_w"] = jnp.transpose(w2, (2, 3, 1, 0))
    if not equal_in_out:
        ws = 0.1 * jax.random.normal(ks[10], (cout, cin, 1, 1), jnp.float32)
        p["convsc_w_oihw"] = ws
        p["convsc_w"] = jnp.transpose(ws[:, :, 0, 0], (1, 0))  # (Cin, Cout)
    return p


def block_ref(x_nchw, params, stride, equal_in_out):
    """Pure-JAX reference (lax.conv) with matching precision (bf16 matmuls)."""
    def bnr(x, s, b):
        return jnp.maximum(x * s[None, :, None, None] + b[None, :, None, None],
                           0.0)

    def conv(x, w, s, pad):
        return jax.lax.conv_general_dilated(
            x.astype(jnp.bfloat16), w.astype(jnp.bfloat16), (s, s),
            [(pad, pad), (pad, pad)],
            dimension_numbers=("NCHW", "OIHW", "NCHW"),
            preferred_element_type=jnp.float32)

    a1 = bnr(x_nchw, params["bn1_scale"], params["bn1_bias"])
    residual = x_nchw if equal_in_out else a1
    c1 = conv(a1, params["conv1_w_oihw"], stride, 1)
    a2 = bnr(c1, params["bn2_scale"], params["bn2_bias"])
    out = conv(a2, params["conv2_w_oihw"], 1, 1)
    if not equal_in_out:
        residual = conv(residual, params["convsc_w_oihw"], stride, 0)
    return out + residual


# ----------------------------------- main -------------------------------------

if __name__ == "__main__":
    key = jax.random.PRNGKey(0)
    k1, k2, k3, k4, k5, k6 = jax.random.split(key, 6)

    # Case 1: in != out, stride 2 -> packed strided conv1 + convShortcut.
    x1 = jax.random.normal(k1, (2, 4, 16, 16), jnp.float32)
    p1 = init_params(k2, cin=4, cout=8, equal_in_out=False)
    y1 = jax.block_until_ready(block_forward(x1, p1, stride=2, equal_in_out=False))
    r1 = block_ref(x1, p1, stride=2, equal_in_out=False)
    assert y1.shape == (2, 8, 8, 8)
    np.testing.assert_allclose(np.asarray(y1), np.asarray(r1), rtol=1e-2, atol=1e-2)

    # Case 2: in == out, stride 1 -> identity shortcut (batch-tiled, bt=2).
    x2 = jax.random.normal(k3, (2, 8, 8, 8), jnp.float32)
    p2 = init_params(k4, cin=8, cout=8, equal_in_out=True)
    y2 = jax.block_until_ready(block_forward(x2, p2, stride=1, equal_in_out=True))
    r2 = block_ref(x2, p2, stride=1, equal_in_out=True)
    assert y2.shape == (2, 8, 8, 8)
    np.testing.assert_allclose(np.asarray(y2), np.asarray(r2), rtol=1e-2, atol=1e-2)

    # Case 3: in != out, stride 1 -> convShortcut without downsampling.
    x3 = jax.random.normal(k5, (2, 4, 16, 16), jnp.float32)
    p3 = init_params(k6, cin=4, cout=8, equal_in_out=False)
    y3 = jax.block_until_ready(block_forward(x3, p3, stride=1, equal_in_out=False))
    r3 = block_ref(x3, p3, stride=1, equal_in_out=False)
    assert y3.shape == (2, 8, 16, 16)
    np.testing.assert_allclose(np.asarray(y3), np.asarray(r3), rtol=1e-2, atol=1e-2)

    print("KERNEL_OK")
</pallas_src>

<mosaic_0001>
module attributes {stable_mosaic.version = 11 : i64} {
  func.func @kernel(%arg0: i32, %arg1: memref<2x16x8x8xf32, #tpu.memory_space<vmem>>, %arg2: memref<1x1x8xf32, #tpu.memory_space<vmem>>, %arg3: memref<1x1x8xf32, #tpu.memory_space<vmem>>, %arg4: memref<9x4x8xbf16, #tpu.memory_space<vmem>>, %arg5: memref<1x8xf32, #tpu.memory_space<vmem>>, %arg6: memref<1x8xf32, #tpu.memory_space<vmem>>, %arg7: memref<9x8x8xbf16, #tpu.memory_space<vmem>>, %arg8: memref<4x8xbf16, #tpu.memory_space<vmem>>, %arg9: memref<2x8x8x8xf32, #tpu.memory_space<vmem>>, %arg10: memref<2x18x9x4xf32, #tpu.memory_space<vmem>>, %arg11: memref<2x18x9x4xf32, #tpu.memory_space<vmem>>, %arg12: memref<2x10x10x8xf32, #tpu.memory_space<vmem>>) attributes {dimension_semantics = [#tpu.dimension_semantics<parallel>], iteration_bounds = array<i64: 1>, scalar_prefetch = 0 : i64, scratch_operands = 3 : i64, tpu.core_type = #tpu.core_type<tc>, window_params = [{transform_indices = @transform_0, window_bounds = array<i64: 2, 16, 8, 8>}, {pipeline_mode = #tpu.pipeline_mode<synchronous>, transform_indices = @transform_1, window_bounds = array<i64: 1, 1, 8>}, {pipeline_mode = #tpu.pipeline_mode<synchronous>, transform_indices = @transform_2, window_bounds = array<i64: 1, 1, 8>}, {pipeline_mode = #tpu.pipeline_mode<synchronous>, transform_indices = @transform_3, window_bounds = array<i64: 9, 4, 8>}, {pipeline_mode = #tpu.pipeline_mode<synchronous>, transform_indices = @transform_4, window_bounds = array<i64: 1, 8>}, {pipeline_mode = #tpu.pipeline_mode<synchronous>, transform_indices = @transform_5, window_bounds = array<i64: 1, 8>}, {pipeline_mode = #tpu.pipeline_mode<synchronous>, transform_indices = @transform_6, window_bounds = array<i64: 9, 8, 8>}, {pipeline_mode = #tpu.pipeline_mode<synchronous>, transform_indices = @transform_7, window_bounds = array<i64: 4, 8>}, {transform_indices = @transform_8, window_bounds = array<i64: 2, 8, 8, 8>}]} {
    %c0 = arith.constant 0 : index
    %c0_0 = arith.constant 0 : index
    %c0_1 = arith.constant 0 : index
    %c0_2 = arith.constant 0 : index
    %0 = vector.load %arg1[%c0, %c0_0, %c0_1, %c0_2] : memref<2x16x8x8xf32, #tpu.memory_space<vmem>>, vector<2x16x8x8xf32>
    %c0_3 = arith.constant 0 : index
    %c0_4 = arith.constant 0 : index
    %c0_5 = arith.constant 0 : index
    %1 = vector.load %arg2[%c0_3, %c0_4, %c0_5] : memref<1x1x8xf32, #tpu.memory_space<vmem>>, vector<1x1x8xf32>
    %2 = vector.shape_cast %1 : vector<1x1x8xf32> to vector<1x1x1x8xf32>
    %3 = vector.broadcast %2 : vector<1x1x1x8xf32> to vector<2x16x8x8xf32>
    %4 = arith.mulf %0, %3 : vector<2x16x8x8xf32>
    %c0_6 = arith.constant 0 : index
    %c0_7 = arith.constant 0 : index
    %c0_8 = arith.constant 0 : index
    %5 = vector.load %arg3[%c0_6, %c0_7, %c0_8] : memref<1x1x8xf32, #tpu.memory_space<vmem>>, vector<1x1x8xf32>
    %6 = vector.shape_cast %5 : vector<1x1x8xf32> to vector<1x1x1x8xf32>
    %7 = vector.broadcast %6 : vector<1x1x1x8xf32> to vector<2x16x8x8xf32>
    %8 = arith.addf %4, %7 : vector<2x16x8x8xf32>
    %cst = arith.constant 0.000000e+00 : f32
    %9 = vector.broadcast %cst : f32 to vector<2x16x8x8xf32>
    %10 = arith.maximumf %8, %9 : vector<2x16x8x8xf32>
    %cst_9 = arith.constant 0.000000e+00 : f32
    %11 = vector.broadcast %cst_9 : f32 to vector<2x1x9x4xf32>
    %cst_10 = arith.constant 0.000000e+00 : f32
    %12 = vector.broadcast %cst_10 : f32 to vector<2x16x1x4xf32>
    %c0_11 = arith.constant 0 : index
    %c0_12 = arith.constant 0 : index
    %c0_13 = arith.constant 0 : index
    %c0_14 = arith.constant 0 : index
    %13 = vector.load %arg10[%c0_11, %c0_12, %c0_13, %c0_14] : memref<2x18x9x4xf32, #tpu.memory_space<vmem>>, vector<2x1x9x4xf32>
    tpu.vector_store %arg10[%c0_11, %c0_12, %c0_13, %c0_14], %11 {strides = array<i32>} : memref<2x18x9x4xf32, #tpu.memory_space<vmem>>, vector<2x1x9x4xf32>,
    %c0_15 = arith.constant 0 : index
    %c17 = arith.constant 17 : index
    %c0_16 = arith.constant 0 : index
    %c0_17 = arith.constant 0 : index
    %14 = vector.load %arg10[%c0_15, %c17, %c0_16, %c0_17] : memref<2x18x9x4xf32, #tpu.memory_space<vmem>>, vector<2x1x9x4xf32>
    tpu.vector_store %arg10[%c0_15, %c17, %c0_16, %c0_17], %11 {strides = array<i32>} : memref<2x18x9x4xf32, #tpu.memory_space<vmem>>, vector<2x1x9x4xf32>,
    %c0_18 = arith.constant 0 : index
    %c1 = arith.constant 1 : index
    %c0_19 = arith.constant 0 : index
    %c0_20 = arith.constant 0 : index
    %15 = vector.load %arg10[%c0_18, %c1, %c0_19, %c0_20] : memref<2x18x9x4xf32, #tpu.memory_space<vmem>>, vector<2x16x1x4xf32>
    tpu.vector_store %arg10[%c0_18, %c1, %c0_19, %c0_20], %12 {strides = array<i32>} : memref<2x18x9x4xf32, #tpu.memory_space<vmem>>, vector<2x16x1x4xf32>,
    %16 = vector.extract_strided_slice %10 {offsets = [0, 0, 0, 4], sizes = [2, 16, 8, 4], strides = [1, 1, 1, 1]} : vector<2x16x8x8xf32> to vector<2x16x8x4xf32>
    %c0_21 = arith.constant 0 : index
    %c1_22 = arith.constant 1 : index
    %c1_23 = arith.constant 1 : index
    %c0_24 = arith.constant 0 : index
    %17 = vector.load %arg10[%c0_21, %c1_22, %c1_23, %c0_24] : memref<2x18x9x4xf32, #tpu.memory_space<vmem>>, vector<2x16x8x4xf32>
    tpu.vector_store %arg10[%c0_21, %c1_22, %c1_23, %c0_24], %16 {strides = array<i32>} : memref<2x18x9x4xf32, #tpu.memory_space<vmem>>, vector<2x16x8x4xf32>,
    %c0_25 = arith.constant 0 : index
    %c0_26 = arith.constant 0 : index
    %c0_27 = arith.constant 0 : index
    %c0_28 = arith.constant 0 : index
    %18 = vector.load %arg11[%c0_25, %c0_26, %c0_27, %c0_28] : memref<2x18x9x4xf32, #tpu.memory_space<vmem>>, vector<2x1x9x4xf32>
    tpu.vector_store %arg11[%c0_25, %c0_26, %c0_27, %c0_28], %11 {strides = array<i32>} : memref<2x18x9x4xf32, #tpu.memory_space<vmem>>, vector<2x1x9x4xf32>,
    %c0_29 = arith.constant 0 : index
    %c17_30 = arith.constant 17 : index
    %c0_31 = arith.constant 0 : index
    %c0_32 = arith.constant 0 : index
    %19 = vector.load %arg11[%c0_29, %c17_30, %c0_31, %c0_32] : memref<2x18x9x4xf32, #tpu.memory_space<vmem>>, vector<2x1x9x4xf32>
    tpu.vector_store %arg11[%c0_29, %c17_30, %c0_31, %c0_32], %11 {strides = array<i32>} : memref<2x18x9x4xf32, #tpu.memory_space<vmem>>, vector<2x1x9x4xf32>,
    %c0_33 = arith.constant 0 : index
    %c1_34 = arith.constant 1 : index
    %c8 = arith.constant 8 : index
    %c0_35 = arith.constant 0 : index
    %20 = vector.load %arg11[%c0_33, %c1_34, %c8, %c0_35] : memref<2x18x9x4xf32, #tpu.memory_space<vmem>>, vector<2x16x1x4xf32>
    tpu.vector_store %arg11[%c0_33, %c1_34, %c8, %c0_35], %12 {strides = array<i32>} : memref<2x18x9x4xf32, #tpu.memory_space<vmem>>, vector<2x16x1x4xf32>,
    %21 = vector.extract_strided_slice %10 {offsets = [0, 0, 0, 0], sizes = [2, 16, 8, 4], strides = [1, 1, 1, 1]} : vector<2x16x8x8xf32> to vector<2x16x8x4xf32>
    %c0_36 = arith.constant 0 : index
    %c1_37 = arith.constant 1 : index
    %c0_38 = arith.constant 0 : index
    %c0_39 = arith.constant 0 : index
    %22 = vector.load %arg11[%c0_36, %c1_37, %c0_38, %c0_39] : memref<2x18x9x4xf32, #tpu.memory_space<vmem>>, vector<2x16x8x4xf32>
    tpu.vector_store %arg11[%c0_36, %c1_37, %c0_38, %c0_39], %21 {strides = array<i32>} : memref<2x18x9x4xf32, #tpu.memory_space<vmem>>, vector<2x16x8x4xf32>,
    %cst_40 = arith.constant 0.000000e+00 : f32
    %23 = vector.broadcast %cst_40 : f32 to vector<128x8xf32>
    %c0_41 = arith.constant 0 : index
    %c0_42 = arith.constant 0 : index
    %c0_43 = arith.constant 0 : index
    %c0_44 = arith.constant 0 : index
    %24 = vector.load %arg10[%c0_41, %c0_42, %c0_43, %c0_44] : memref<2x18x9x4xf32, #tpu.memory_space<vmem>>, vector<2x18x9x4xf32>
    %25 = vector.shape_cast %24 : vector<2x18x9x4xf32> to vector<2x9x2x9x4xf32>
    %c0_45 = arith.constant 0 : index
    %c0_46 = arith.constant 0 : index
    %c0_47 = arith.constant 0 : index
    %c0_48 = arith.constant 0 : index
    %26 = vector.load %arg11[%c0_45, %c0_46, %c0_47, %c0_48] : memref<2x18x9x4xf32, #tpu.memory_space<vmem>>, vector<2x18x9x4xf32>
    %27 = vector.shape_cast %26 : vector<2x18x9x4xf32> to vector<2x9x2x9x4xf32>
    %28 = vector.extract_strided_slice %25 {offsets = [0, 0, 0, 0, 0], sizes = [2, 8, 1, 9, 4], strides = [1, 1, 1, 1, 1]} : vector<2x9x2x9x4xf32> to vector<2x8x1x9x4xf32>
    %29 = vector.shape_cast %28 : vector<2x8x1x9x4xf32> to vector<2x8x9x4xf32>
    %30 = vector.extract_strided_slice %27 {offsets = [0, 0, 0, 0, 0], sizes = [2, 8, 1, 9, 4], strides = [1, 1, 1, 1, 1]} : vector<2x9x2x9x4xf32> to vector<2x8x1x9x4xf32>
    %31 = vector.shape_cast %30 : vector<2x8x1x9x4xf32> to vector<2x8x9x4xf32>
    %32 = vector.extract_strided_slice %29 {offsets = [0, 0, 0, 0], sizes = [2, 8, 8, 4], strides = [1, 1, 1, 1]} : vector<2x8x9x4xf32> to vector<2x8x8x4xf32>
    %33 = vector.extract_strided_slice %31 {offsets = [0, 0, 0, 0], sizes = [2, 8, 8, 4], strides = [1, 1, 1, 1]} : vector<2x8x9x4xf32> to vector<2x8x8x4xf32>
    %34 = vector.extract_strided_slice %29 {offsets = [0, 0, 1, 0], sizes = [2, 8, 8, 4], strides = [1, 1, 1, 1]} : vector<2x8x9x4xf32> to vector<2x8x8x4xf32>
    %35 = vector.shape_cast %32 : vector<2x8x8x4xf32> to vector<128x4xf32>
    %36 = arith.truncf %35 : vector<128x4xf32> to vector<128x4xbf16>
    %c0_49 = arith.constant 0 : index
    %c0_50 = arith.constant 0 : index
    %c0_51 = arith.constant 0 : index
    %37 = vector.load %arg4[%c0_49, %c0_50, %c0_51] : memref<9x4x8xbf16, #tpu.memory_space<vmem>>, vector<1x4x8xbf16>
    %38 = vector.shape_cast %37 : vector<1x4x8xbf16> to vector<4x8xbf16>
    %cst_52 = arith.constant dense<0.000000e+00> : vector<128x8xf32>
    %39 = tpu.matmul %36, %38, %cst_52 {dimension_numbers = #tpu.dot_dimension_numbers<[1], [0], [0], [1], [0, 0, 1, 1], [], []>} : vector<128x4xbf16>, vector<4x8xbf16>, vector<128x8xf32> -> vector<128x8xf32>
    %40 = arith.addf %23, %39 : vector<128x8xf32>
    %41 = vector.shape_cast %33 : vector<2x8x8x4xf32> to vector<128x4xf32>
    %42 = arith.truncf %41 : vector<128x4xf32> to vector<128x4xbf16>
    %c1_53 = arith.constant 1 : index
    %c0_54 = arith.constant 0 : index
    %c0_55 = arith.constant 0 : index
    %43 = vector.load %arg4[%c1_53, %c0_54, %c0_55] : memref<9x4x8xbf16, #tpu.memory_space<vmem>>, vector<1x4x8xbf16>
    %44 = vector.shape_cast %43 : vector<1x4x8xbf16> to vector<4x8xbf16>
    %cst_56 = arith.constant dense<0.000000e+00> : vector<128x8xf32>
    %45 = tpu.matmul %42, %44, %cst_56 {dimension_numbers = #tpu.dot_dimension_numbers<[1], [0], [0], [1], [0, 0, 1, 1], [], []>} : vector<128x4xbf16>, vector<4x8xbf16>, vector<128x8xf32> -> vector<128x8xf32>
    %46 = arith.addf %40, %45 : vector<128x8xf32>
    %47 = vector.shape_cast %34 : vector<2x8x8x4xf32> to vector<128x4xf32>
    %48 = arith.truncf %47 : vector<128x4xf32> to vector<128x4xbf16>
    %c2 = arith.constant 2 : index
    %c0_57 = arith.constant 0 : index
    %c0_58 = arith.constant 0 : index
    %49 = vector.load %arg4[%c2, %c0_57, %c0_58] : memref<9x4x8xbf16, #tpu.memory_space<vmem>>, vector<1x4x8xbf16>
    %50 = vector.shape_cast %49 : vector<1x4x8xbf16> to vector<4x8xbf16>
    %cst_59 = arith.constant dense<0.000000e+00> : vector<128x8xf32>
    %51 = tpu.matmul %48, %50, %cst_59 {dimension_numbers = #tpu.dot_dimension_numbers<[1], [0], [0], [1], [0, 0, 1, 1], [], []>} : vector<128x4xbf16>, vector<4x8xbf16>, vector<128x8xf32> -> vector<128x8xf32>
    %52 = arith.addf %46, %51 : vector<128x8xf32>
    %53 = vector.extract_strided_slice %25 {offsets = [0, 0, 1, 0, 0], sizes = [2, 8, 1, 9, 4], strides = [1, 1, 1, 1, 1]} : vector<2x9x2x9x4xf32> to vector<2x8x1x9x4xf32>
    %54 = vector.shape_cast %53 : vector<2x8x1x9x4xf32> to vector<2x8x9x4xf32>
    %55 = vector.extract_strided_slice %27 {offsets = [0, 0, 1, 0, 0], sizes = [2, 8, 1, 9, 4], strides = [1, 1, 1, 1, 1]} : vector<2x9x2x9x4xf32> to vector<2x8x1x9x4xf32>
    %56 = vector.shape_cast %55 : vector<2x8x1x9x4xf32> to vector<2x8x9x4xf32>
    %57 = vector.extract_strided_slice %54 {offsets = [0, 0, 0, 0], sizes = [2, 8, 8, 4], strides = [1, 1, 1, 1]} : vector<2x8x9x4xf32> to vector<2x8x8x4xf32>
    %58 = vector.extract_strided_slice %56 {offsets = [0, 0, 0, 0], sizes = [2, 8, 8, 4], strides = [1, 1, 1, 1]} : vector<2x8x9x4xf32> to vector<2x8x8x4xf32>
    %59 = vector.extract_strided_slice %54 {offsets = [0, 0, 1, 0], sizes = [2, 8, 8, 4], strides = [1, 1, 1, 1]} : vector<2x8x9x4xf32> to vector<2x8x8x4xf32>
    %60 = vector.shape_cast %57 : vector<2x8x8x4xf32> to vector<128x4xf32>
    %61 = arith.truncf %60 : vector<128x4xf32> to vector<128x4xbf16>
    %c3 = arith.constant 3 : index
    %c0_60 = arith.constant 0 : index
    %c0_61 = arith.constant 0 : index
    %62 = vector.load %arg4[%c3, %c0_60, %c0_61] : memref<9x4x8xbf16, #tpu.memory_space<vmem>>, vector<1x4x8xbf16>
    %63 = vector.shape_cast %62 : vector<1x4x8xbf16> to vector<4x8xbf16>
    %cst_62 = arith.constant dense<0.000000e+00> : vector<128x8xf32>
    %64 = tpu.matmul %61, %63, %cst_62 {dimension_numbers = #tpu.dot_dimension_numbers<[1], [0], [0], [1], [0, 0, 1, 1], [], []>} : vector<128x4xbf16>, vector<4x8xbf16>, vector<128x8xf32> -> vector<128x8xf32>
    %65 = arith.addf %52, %64 : vector<128x8xf32>
    %66 = vector.shape_cast %58 : vector<2x8x8x4xf32> to vector<128x4xf32>
    %67 = arith.truncf %66 : vector<128x4xf32> to vector<128x4xbf16>
    %c4 = arith.constant 4 : index
    %c0_63 = arith.constant 0 : index
    %c0_64 = arith.constant 0 : index
    %68 = vector.load %arg4[%c4, %c0_63, %c0_64] : memref<9x4x8xbf16, #tpu.memory_space<vmem>>, vector<1x4x8xbf16>
    %69 = vector.shape_cast %68 : vector<1x4x8xbf16> to vector<4x8xbf16>
    %cst_65 = arith.constant dense<0.000000e+00> : vector<128x8xf32>
    %70 = tpu.matmul %67, %69, %cst_65 {dimension_numbers = #tpu.dot_dimension_numbers<[1], [0], [0], [1], [0, 0, 1, 1], [], []>} : vector<128x4xbf16>, vector<4x8xbf16>, vector<128x8xf32> -> vector<128x8xf32>
    %71 = arith.addf %65, %70 : vector<128x8xf32>
    %72 = vector.shape_cast %59 : vector<2x8x8x4xf32> to vector<128x4xf32>
    %73 = arith.truncf %72 : vector<128x4xf32> to vector<128x4xbf16>
    %c5 = arith.constant 5 : index
    %c0_66 = arith.constant 0 : index
    %c0_67 = arith.constant 0 : index
    %74 = vector.load %arg4[%c5, %c0_66, %c0_67] : memref<9x4x8xbf16, #tpu.memory_space<vmem>>, vector<1x4x8xbf16>
    %75 = vector.shape_cast %74 : vector<1x4x8xbf16> to vector<4x8xbf16>
    %cst_68 = arith.constant dense<0.000000e+00> : vector<128x8xf32>
    %76 = tpu.matmul %73, %75, %cst_68 {dimension_numbers = #tpu.dot_dimension_numbers<[1], [0], [0], [1], [0, 0, 1, 1], [], []>} : vector<128x4xbf16>, vector<4x8xbf16>, vector<128x8xf32> -> vector<128x8xf32>
    %77 = arith.addf %71, %76 : vector<128x8xf32>
    %78 = vector.extract_strided_slice %25 {offsets = [0, 1, 0, 0, 0], sizes = [2, 8, 1, 9, 4], strides = [1, 1, 1, 1, 1]} : vector<2x9x2x9x4xf32> to vector<2x8x1x9x4xf32>
    %79 = vector.shape_cast %78 : vector<2x8x1x9x4xf32> to vector<2x8x9x4xf32>
    %80 = vector.extract_strided_slice %27 {offsets = [0, 1, 0, 0, 0], sizes = [2, 8, 1, 9, 4], strides = [1, 1, 1, 1, 1]} : vector<2x9x2x9x4xf32> to vector<2x8x1x9x4xf32>
    %81 = vector.shape_cast %80 : vector<2x8x1x9x4xf32> to vector<2x8x9x4xf32>
    %82 = vector.extract_strided_slice %79 {offsets = [0, 0, 0, 0], sizes = [2, 8, 8, 4], strides = [1, 1, 1, 1]} : vector<2x8x9x4xf32> to vector<2x8x8x4xf32>
    %83 = vector.extract_strided_slice %81 {offsets = [0, 0, 0, 0], sizes = [2, 8, 8, 4], strides = [1, 1, 1, 1]} : vector<2x8x9x4xf32> to vector<2x8x8x4xf32>
    %84 = vector.extract_strided_slice %79 {offsets = [0, 0, 1, 0], sizes = [2, 8, 8, 4], strides = [1, 1, 1, 1]} : vector<2x8x9x4xf32> to vector<2x8x8x4xf32>
    %85 = vector.shape_cast %82 : vector<2x8x8x4xf32> to vector<128x4xf32>
    %86 = arith.truncf %85 : vector<128x4xf32> to vector<128x4xbf16>
    %c6 = arith.constant 6 : index
    %c0_69 = arith.constant 0 : index
    %c0_70 = arith.constant 0 : index
    %87 = vector.load %arg4[%c6, %c0_69, %c0_70] : memref<9x4x8xbf16, #tpu.memory_space<vmem>>, vector<1x4x8xbf16>
    %88 = vector.shape_cast %87 : vector<1x4x8xbf16> to vector<4x8xbf16>
    %cst_71 = arith.constant dense<0.000000e+00> : vector<128x8xf32>
    %89 = tpu.matmul %86, %88, %cst_71 {dimension_numbers = #tpu.dot_dimension_numbers<[1], [0], [0], [1], [0, 0, 1, 1], [], []>} : vector<128x4xbf16>, vector<4x8xbf16>, vector<128x8xf32> -> vector<128x8xf32>
    %90 = arith.addf %77, %89 : vector<128x8xf32>
    %91 = vector.shape_cast %83 : vector<2x8x8x4xf32> to vector<128x4xf32>
    %92 = arith.truncf %91 : vector<128x4xf32> to vector<128x4xbf16>
    %c7 = arith.constant 7 : index
    %c0_72 = arith.constant 0 : index
    %c0_73 = arith.constant 0 : index
    %93 = vector.load %arg4[%c7, %c0_72, %c0_73] : memref<9x4x8xbf16, #tpu.memory_space<vmem>>, vector<1x4x8xbf16>
    %94 = vector.shape_cast %93 : vector<1x4x8xbf16> to vector<4x8xbf16>
    %cst_74 = arith.constant dense<0.000000e+00> : vector<128x8xf32>
    %95 = tpu.matmul %92, %94, %cst_74 {dimension_numbers = #tpu.dot_dimension_numbers<[1], [0], [0], [1], [0, 0, 1, 1], [], []>} : vector<128x4xbf16>, vector<4x8xbf16>, vector<128x8xf32> -> vector<128x8xf32>
    %96 = arith.addf %90, %95 : vector<128x8xf32>
    %97 = vector.shape_cast %84 : vector<2x8x8x4xf32> to vector<128x4xf32>
    %98 = arith.truncf %97 : vector<128x4xf32> to vector<128x4xbf16>
    %c8_75 = arith.constant 8 : index
    %c0_76 = arith.constant 0 : index
    %c0_77 = arith.constant 0 : index
    %99 = vector.load %arg4[%c8_75, %c0_76, %c0_77] : memref<9x4x8xbf16, #tpu.memory_space<vmem>>, vector<1x4x8xbf16>
    %100 = vector.shape_cast %99 : vector<1x4x8xbf16> to vector<4x8xbf16>
    %cst_78 = arith.constant dense<0.000000e+00> : vector<128x8xf32>
    %101 = tpu.matmul %98, %100, %cst_78 {dimension_numbers = #tpu.dot_dimension_numbers<[1], [0], [0], [1], [0, 0, 1, 1], [], []>} : vector<128x4xbf16>, vector<4x8xbf16>, vector<128x8xf32> -> vector<128x8xf32>
    %102 = arith.addf %96, %101 : vector<128x8xf32>
    %cst_79 = arith.constant 0.000000e+00 : f32
    %103 = vector.broadcast %cst_79 : f32 to vector<2x1x10x8xf32>
    %cst_80 = arith.constant 0.000000e+00 : f32
    %104 = vector.broadcast %cst_80 : f32 to vector<2x8x1x8xf32>
    %c0_81 = arith.constant 0 : index
    %c0_82 = arith.constant 0 : index
    %c0_83 = arith.constant 0 : index
    %c0_84 = arith.constant 0 : index
    %105 = vector.load %arg12[%c0_81, %c0_82, %c0_83, %c0_84] : memref<2x10x10x8xf32, #tpu.memory_space<vmem>>, vector<2x1x10x8xf32>
    tpu.vector_store %arg12[%c0_81, %c0_82, %c0_83, %c0_84], %103 {strides = array<i32>} : memref<2x10x10x8xf32, #tpu.memory_space<vmem>>, vector<2x1x10x8xf32>,
    %c0_85 = arith.constant 0 : index
    %c9 = arith.constant 9 : index
    %c0_86 = arith.constant 0 : index
    %c0_87 = arith.constant 0 : index
    %106 = vector.load %arg12[%c0_85, %c9, %c0_86, %c0_87] : memref<2x10x10x8xf32, #tpu.memory_space<vmem>>, vector<2x1x10x8xf32>
    tpu.vector_store %arg12[%c0_85, %c9, %c0_86, %c0_87], %103 {strides = array<i32>} : memref<2x10x10x8xf32, #tpu.memory_space<vmem>>, vector<2x1x10x8xf32>,
    %c0_88 = arith.constant 0 : index
    %c1_89 = arith.constant 1 : index
    %c0_90 = arith.constant 0 : index
    %c0_91 = arith.constant 0 : index
    %107 = vector.load %arg12[%c0_88, %c1_89, %c0_90, %c0_91] : memref<2x10x10x8xf32, #tpu.memory_space<vmem>>, vector<2x8x1x8xf32>
    tpu.vector_store %arg12[%c0_88, %c1_89, %c0_90, %c0_91], %104 {strides = array<i32>} : memref<2x10x10x8xf32, #tpu.memory_space<vmem>>, vector<2x8x1x8xf32>,
    %c0_92 = arith.constant 0 : index
    %c1_93 = arith.constant 1 : index
    %c9_94 = arith.constant 9 : index
    %c0_95 = arith.constant 0 : index
    %108 = vector.load %arg12[%c0_92, %c1_93, %c9_94, %c0_95] : memref<2x10x10x8xf32, #tpu.memory_space<vmem>>, vector<2x8x1x8xf32>
    tpu.vector_store %arg12[%c0_92, %c1_93, %c9_94, %c0_95], %104 {strides = array<i32>} : memref<2x10x10x8xf32, #tpu.memory_space<vmem>>, vector<2x8x1x8xf32>,
    %c0_96 = arith.constant 0 : index
    %c0_97 = arith.constant 0 : index
    %109 = vector.load %arg5[%c0_96, %c0_97] : memref<1x8xf32, #tpu.memory_space<vmem>>, vector<1x8xf32>
    %110 = vector.broadcast %109 : vector<1x8xf32> to vector<128x8xf32>
    %111 = arith.mulf %102, %110 : vector<128x8xf32>
    %c0_98 = arith.constant 0 : index
    %c0_99 = arith.constant 0 : index
    %112 = vector.load %arg6[%c0_98, %c0_99] : memref<1x8xf32, #tpu.memory_space<vmem>>, vector<1x8xf32>
    %113 = vector.broadcast %112 : vector<1x8xf32> to vector<128x8xf32>
    %114 = arith.addf %111, %113 : vector<128x8xf32>
    %cst_100 = arith.constant 0.000000e+00 : f32
    %115 = vector.broadcast %cst_100 : f32 to vector<128x8xf32>
    %116 = arith.maximumf %114, %115 : vector<128x8xf32>
    %117 = vector.shape_cast %116 : vector<128x8xf32> to vector<2x8x8x8xf32>
    %c0_101 = arith.constant 0 : index
    %c1_102 = arith.constant 1 : index
    %c1_103 = arith.constant 1 : index
    %c0_104 = arith.constant 0 : index
    %118 = vector.load %arg12[%c0_101, %c1_102, %c1_103, %c0_104] : memref<2x10x10x8xf32, #tpu.memory_space<vmem>>, vector<2x8x8x8xf32>
    tpu.vector_store %arg12[%c0_101, %c1_102, %c1_103, %c0_104], %117 {strides = array<i32>} : memref<2x10x10x8xf32, #tpu.memory_space<vmem>>, vector<2x8x8x8xf32>,
    %cst_105 = arith.constant 0.000000e+00 : f32
    %119 = vector.broadcast %cst_105 : f32 to vector<128x8xf32>
    %c0_106 = arith.constant 0 : index
    %c0_107 = arith.constant 0 : index
    %c0_108 = arith.constant 0 : index
    %c0_109 = arith.constant 0 : index
    %120 = vector.load %arg12[%c0_106, %c0_107, %c0_108, %c0_109] : memref<2x10x10x8xf32, #tpu.memory_space<vmem>>, vector<2x8x8x8xf32>
    %121 = vector.shape_cast %120 : vector<2x8x8x8xf32> to vector<128x8xf32>
    %122 = arith.truncf %121 : vector<128x8xf32> to vector<128x8xbf16>
    %c0_110 = arith.constant 0 : index
    %c0_111 = arith.constant 0 : index
    %c0_112 = arith.constant 0 : index
    %123 = vector.load %arg7[%c0_110, %c0_111, %c0_112] : memref<9x8x8xbf16, #tpu.memory_space<vmem>>, vector<1x8x8xbf16>
    %124 = vector.shape_cast %123 : vector<1x8x8xbf16> to vector<8x8xbf16>
    %cst_113 = arith.constant dense<0.000000e+00> : vector<128x8xf32>
    %125 = tpu.matmul %122, %124, %cst_113 {dimension_numbers = #tpu.dot_dimension_numbers<[1], [0], [0], [1], [0, 0, 1, 1], [], []>} : vector<128x8xbf16>, vector<8x8xbf16>, vector<128x8xf32> -> vector<128x8xf32>
    %126 = arith.addf %119, %125 : vector<128x8xf32>
    %c0_114 = arith.constant 0 : index
    %c0_115 = arith.constant 0 : index
    %c1_116 = arith.constant 1 : index
    %c0_117 = arith.constant 0 : index
    %127 = vector.load %arg12[%c0_114, %c0_115, %c1_116, %c0_117] : memref<2x10x10x8xf32, #tpu.memory_space<vmem>>, vector<2x8x8x8xf32>
    %128 = vector.shape_cast %127 : vector<2x8x8x8xf32> to vector<128x8xf32>
    %129 = arith.truncf %128 : vector<128x8xf32> to vector<128x8xbf16>
    %c1_118 = arith.constant 1 : index
    %c0_119 = arith.constant 0 : index
    %c0_120 = arith.constant 0 : index
    %130 = vector.load %arg7[%c1_118, %c0_119, %c0_120] : memref<9x8x8xbf16, #tpu.memory_space<vmem>>, vector<1x8x8xbf16>
    %131 = vector.shape_cast %130 : vector<1x8x8xbf16> to vector<8x8xbf16>
    %cst_121 = arith.constant dense<0.000000e+00> : vector<128x8xf32>
    %132 = tpu.matmul %129, %131, %cst_121 {dimension_numbers = #tpu.dot_dimension_numbers<[1], [0], [0], [1], [0, 0, 1, 1], [], []>} : vector<128x8xbf16>, vector<8x8xbf16>, vector<128x8xf32> -> vector<128x8xf32>
    %133 = arith.addf %126, %132 : vector<128x8xf32>
    %c0_122 = arith.constant 0 : index
    %c0_123 = arith.constant 0 : index
    %c2_124 = arith.constant 2 : index
    %c0_125 = arith.constant 0 : index
    %134 = vector.load %arg12[%c0_122, %c0_123, %c2_124, %c0_125] : memref<2x10x10x8xf32, #tpu.memory_space<vmem>>, vector<2x8x8x8xf32>
    %135 = vector.shape_cast %134 : vector<2x8x8x8xf32> to vector<128x8xf32>
    %136 = arith.truncf %135 : vector<128x8xf32> to vector<128x8xbf16>
    %c2_126 = arith.constant 2 : index
    %c0_127 = arith.constant 0 : index
    %c0_128 = arith.constant 0 : index
    %137 = vector.load %arg7[%c2_126, %c0_127, %c0_128] : memref<9x8x8xbf16, #tpu.memory_space<vmem>>, vector<1x8x8xbf16>
    %138 = vector.shape_cast %137 : vector<1x8x8xbf16> to vector<8x8xbf16>
    %cst_129 = arith.constant dense<0.000000e+00> : vector<128x8xf32>
    %139 = tpu.matmul %136, %138, %cst_129 {dimension_numbers = #tpu.dot_dimension_numbers<[1], [0], [0], [1], [0, 0, 1, 1], [], []>} : vector<128x8xbf16>, vector<8x8xbf16>, vector<128x8xf32> -> vector<128x8xf32>
    %140 = arith.addf %133, %139 : vector<128x8xf32>
    %c0_130 = arith.constant 0 : index
    %c1_131 = arith.constant 1 : index
    %c0_132 = arith.constant 0 : index
    %c0_133 = arith.constant 0 : index
    %141 = vector.load %arg12[%c0_130, %c1_131, %c0_132, %c0_133] : memref<2x10x10x8xf32, #tpu.memory_space<vmem>>, vector<2x8x8x8xf32>
    %142 = vector.shape_cast %141 : vector<2x8x8x8xf32> to vector<128x8xf32>
    %143 = arith.truncf %142 : vector<128x8xf32> to vector<128x8xbf16>
    %c3_134 = arith.constant 3 : index
    %c0_135 = arith.constant 0 : index
    %c0_136 = arith.constant 0 : index
    %144 = vector.load %arg7[%c3_134, %c0_135, %c0_136] : memref<9x8x8xbf16, #tpu.memory_space<vmem>>, vector<1x8x8xbf16>
    %145 = vector.shape_cast %144 : vector<1x8x8xbf16> to vector<8x8xbf16>
    %cst_137 = arith.constant dense<0.000000e+00> : vector<128x8xf32>
    %146 = tpu.matmul %143, %145, %cst_137 {dimension_numbers = #tpu.dot_dimension_numbers<[1], [0], [0], [1], [0, 0, 1, 1], [], []>} : vector<128x8xbf16>, vector<8x8xbf16>, vector<128x8xf32> -> vector<128x8xf32>
    %147 = arith.addf %140, %146 : vector<128x8xf32>
    %c0_138 = arith.constant 0 : index
    %c1_139 = arith.constant 1 : index
    %c1_140 = arith.constant 1 : index
    %c0_141 = arith.constant 0 : index
    %148 = vector.load %arg12[%c0_138, %c1_139, %c1_140, %c0_141] : memref<2x10x10x8xf32, #tpu.memory_space<vmem>>, vector<2x8x8x8xf32>
    %149 = vector.shape_cast %148 : vector<2x8x8x8xf32> to vector<128x8xf32>
    %150 = arith.truncf %149 : vector<128x8xf32> to vector<128x8xbf16>
    %c4_142 = arith.constant 4 : index
    %c0_143 = arith.constant 0 : index
    %c0_144 = arith.constant 0 : index
    %151 = vector.load %arg7[%c4_142, %c0_143, %c0_144] : memref<9x8x8xbf16, #tpu.memory_space<vmem>>, vector<1x8x8xbf16>
    %152 = vector.shape_cast %151 : vector<1x8x8xbf16> to vector<8x8xbf16>
    %cst_145 = arith.constant dense<0.000000e+00> : vector<128x8xf32>
    %153 = tpu.matmul %150, %152, %cst_145 {dimension_numbers = #tpu.dot_dimension_numbers<[1], [0], [0], [1], [0, 0, 1, 1], [], []>} : vector<128x8xbf16>, vector<8x8xbf16>, vector<128x8xf32> -> vector<128x8xf32>
    %154 = arith.addf %147, %153 : vector<128x8xf32>
    %c0_146 = arith.constant 0 : index
    %c1_147 = arith.constant 1 : index
    %c2_148 = arith.constant 2 : index
    %c0_149 = arith.constant 0 : index
    %155 = vector.load %arg12[%c0_146, %c1_147, %c2_148, %c0_149] : memref<2x10x10x8xf32, #tpu.memory_space<vmem>>, vector<2x8x8x8xf32>
    %156 = vector.shape_cast %155 : vector<2x8x8x8xf32> to vector<128x8xf32>
    %157 = arith.truncf %156 : vector<128x8xf32> to vector<128x8xbf16>
    %c5_150 = arith.constant 5 : index
    %c0_151 = arith.constant 0 : index
    %c0_152 = arith.constant 0 : index
    %158 = vector.load %arg7[%c5_150, %c0_151, %c0_152] : memref<9x8x8xbf16, #tpu.memory_space<vmem>>, vector<1x8x8xbf16>
    %159 = vector.shape_cast %158 : vector<1x8x8xbf16> to vector<8x8xbf16>
    %cst_153 = arith.constant dense<0.000000e+00> : vector<128x8xf32>
    %160 = tpu.matmul %157, %159, %cst_153 {dimension_numbers = #tpu.dot_dimension_numbers<[1], [0], [0], [1], [0, 0, 1, 1], [], []>} : vector<128x8xbf16>, vector<8x8xbf16>, vector<128x8xf32> -> vector<128x8xf32>
    %161 = arith.addf %154, %160 : vector<128x8xf32>
    %c0_154 = arith.constant 0 : index
    %c2_155 = arith.constant 2 : index
    %c0_156 = arith.constant 0 : index
    %c0_157 = arith.constant 0 : index
    %162 = vector.load %arg12[%c0_154, %c2_155, %c0_156, %c0_157] : memref<2x10x10x8xf32, #tpu.memory_space<vmem>>, vector<2x8x8x8xf32>
    %163 = vector.shape_cast %162 : vector<2x8x8x8xf32> to vector<128x8xf32>
    %164 = arith.truncf %163 : vector<128x8xf32> to vector<128x8xbf16>
    %c6_158 = arith.constant 6 : index
    %c0_159 = arith.constant 0 : index
    %c0_160 = arith.constant 0 : index
    %165 = vector.load %arg7[%c6_158, %c0_159, %c0_160] : memref<9x8x8xbf16, #tpu.memory_space<vmem>>, vector<1x8x8xbf16>
    %166 = vector.shape_cast %165 : vector<1x8x8xbf16> to vector<8x8xbf16>
    %cst_161 = arith.constant dense<0.000000e+00> : vector<128x8xf32>
    %167 = tpu.matmul %164, %166, %cst_161 {dimension_numbers = #tpu.dot_dimension_numbers<[1], [0], [0], [1], [0, 0, 1, 1], [], []>} : vector<128x8xbf16>, vector<8x8xbf16>, vector<128x8xf32> -> vector<128x8xf32>
    %168 = arith.addf %161, %167 : vector<128x8xf32>
    %c0_162 = arith.constant 0 : index
    %c2_163 = arith.constant 2 : index
    %c1_164 = arith.constant 1 : index
    %c0_165 = arith.constant 0 : index
    %169 = vector.load %arg12[%c0_162, %c2_163, %c1_164, %c0_165] : memref<2x10x10x8xf32, #tpu.memory_space<vmem>>, vector<2x8x8x8xf32>
    %170 = vector.shape_cast %169 : vector<2x8x8x8xf32> to vector<128x8xf32>
    %171 = arith.truncf %170 : vector<128x8xf32> to vector<128x8xbf16>
    %c7_166 = arith.constant 7 : index
    %c0_167 = arith.constant 0 : index
    %c0_168 = arith.constant 0 : index
    %172 = vector.load %arg7[%c7_166, %c0_167, %c0_168] : memref<9x8x8xbf16, #tpu.memory_space<vmem>>, vector<1x8x8xbf16>
    %173 = vector.shape_cast %172 : vector<1x8x8xbf16> to vector<8x8xbf16>
    %cst_169 = arith.constant dense<0.000000e+00> : vector<128x8xf32>
    %174 = tpu.matmul %171, %173, %cst_169 {dimension_numbers = #tpu.dot_dimension_numbers<[1], [0], [0], [1], [0, 0, 1, 1], [], []>} : vector<128x8xbf16>, vector<8x8xbf16>, vector<128x8xf32> -> vector<128x8xf32>
    %175 = arith.addf %168, %174 : vector<128x8xf32>
    %c0_170 = arith.constant 0 : index
    %c2_171 = arith.constant 2 : index
    %c2_172 = arith.constant 2 : index
    %c0_173 = arith.constant 0 : index
    %176 = vector.load %arg12[%c0_170, %c2_171, %c2_172, %c0_173] : memref<2x10x10x8xf32, #tpu.memory_space<vmem>>, vector<2x8x8x8xf32>
    %177 = vector.shape_cast %176 : vector<2x8x8x8xf32> to vector<128x8xf32>
    %178 = arith.truncf %177 : vector<128x8xf32> to vector<128x8xbf16>
    %c8_174 = arith.constant 8 : index
    %c0_175 = arith.constant 0 : index
    %c0_176 = arith.constant 0 : index
    %179 = vector.load %arg7[%c8_174, %c0_175, %c0_176] : memref<9x8x8xbf16, #tpu.memory_space<vmem>>, vector<1x8x8xbf16>
    %180 = vector.shape_cast %179 : vector<1x8x8xbf16> to vector<8x8xbf16>
    %cst_177 = arith.constant dense<0.000000e+00> : vector<128x8xf32>
    %181 = tpu.matmul %178, %180, %cst_177 {dimension_numbers = #tpu.dot_dimension_numbers<[1], [0], [0], [1], [0, 0, 1, 1], [], []>} : vector<128x8xbf16>, vector<8x8xbf16>, vector<128x8xf32> -> vector<128x8xf32>
    %182 = arith.addf %175, %181 : vector<128x8xf32>
    %183 = vector.shape_cast %10 : vector<2x16x8x8xf32> to vector<2x8x2x8x8xf32>
    %184 = vector.extract_strided_slice %183 {offsets = [0, 0, 0, 0, 0], sizes = [2, 8, 1, 8, 4], strides = [1, 1, 1, 1, 1]} : vector<2x8x2x8x8xf32> to vector<2x8x1x8x4xf32>
    %185 = vector.shape_cast %184 : vector<2x8x1x8x4xf32> to vector<2x8x8x4xf32>
    %186 = vector.shape_cast %185 : vector<2x8x8x4xf32> to vector<128x4xf32>
    %187 = arith.truncf %186 : vector<128x4xf32> to vector<128x4xbf16>
    %c0_178 = arith.constant 0 : index
    %c0_179 = arith.constant 0 : index
    %188 = vector.load %arg8[%c0_178, %c0_179] : memref<4x8xbf16, #tpu.memory_space<vmem>>, vector<4x8xbf16>
    %cst_180 = arith.constant dense<0.000000e+00> : vector<128x8xf32>
    %189 = tpu.matmul %187, %188, %cst_180 {dimension_numbers = #tpu.dot_dimension_numbers<[1], [0], [0], [1], [0, 0, 1, 1], [], []>} : vector<128x4xbf16>, vector<4x8xbf16>, vector<128x8xf32> -> vector<128x8xf32>
    %190 = arith.addf %182, %189 : vector<128x8xf32>
    %191 = vector.shape_cast %190 : vector<128x8xf32> to vector<2x8x8x8xf32>
    %c0_181 = arith.constant 0 : index
    %c0_182 = arith.constant 0 : index
    %c0_183 = arith.constant 0 : index
    %c0_184 = arith.constant 0 : index
    %192 = vector.load %arg9[%c0_181, %c0_182, %c0_183, %c0_184] : memref<2x8x8x8xf32, #tpu.memory_space<vmem>>, vector<2x8x8x8xf32>
    tpu.vector_store %arg9[%c0_181, %c0_182, %c0_183, %c0_184], %191 {strides = array<i32>} : memref<2x8x8x8xf32, #tpu.memory_space<vmem>>, vector<2x8x8x8xf32>,
    return
  }
  func.func @transform_0(%arg0: i32) -> (i32, i32, i32, i32) {
    %c0_i32 = arith.constant 0 : i32
    %c0_i32_0 = arith.constant 0 : i32
    %c0_i32_1 = arith.constant 0 : i32
    %c0_i32_2 = arith.constant 0 : i32
    return %arg0, %c0_i32, %c0_i32_0, %c0_i32_1 : i32, i32, i32, i32
  }
  func.func @transform_1(%arg0: i32) -> (i32, i32, i32) {
    %c0_i32 = arith.constant 0 : i32
    %c0_i32_0 = arith.constant 0 : i32
    %c0_i32_1 = arith.constant 0 : i32
    %c0_i32_2 = arith.constant 0 : i32
    return %c0_i32, %c0_i32_0, %c0_i32_1 : i32, i32, i32
  }
  func.func @transform_2(%arg0: i32) -> (i32, i32, i32) {
    %c0_i32 = arith.constant 0 : i32
    %c0_i32_0 = arith.constant 0 : i32
    %c0_i32_1 = arith.constant 0 : i32
    %c0_i32_2 = arith.constant 0 : i32
    return %c0_i32, %c0_i32_0, %c0_i32_1 : i32, i32, i32
  }
  func.func @transform_3(%arg0: i32) -> (i32, i32, i32) {
    %c0_i32 = arith.constant 0 : i32
    %c0_i32_0 = arith.constant 0 : i32
    %c0_i32_1 = arith.constant 0 : i32
    %c0_i32_2 = arith.constant 0 : i32
    return %c0_i32, %c0_i32_0, %c0_i32_1 : i32, i32, i32
  }
  func.func @transform_4(%arg0: i32) -> (i32, i32) {
    %c0_i32 = arith.constant 0 : i32
    %c0_i32_0 = arith.constant 0 : i32
    %c0_i32_1 = arith.constant 0 : i32
    return %c0_i32, %c0_i32_0 : i32, i32
  }
  func.func @transform_5(%arg0: i32) -> (i32, i32) {
    %c0_i32 = arith.constant 0 : i32
    %c0_i32_0 = arith.constant 0 : i32
    %c0_i32_1 = arith.constant 0 : i32
    return %c0_i32, %c0_i32_0 : i32, i32
  }
  func.func @transform_6(%arg0: i32) -> (i32, i32, i32) {
    %c0_i32 = arith.constant 0 : i32
    %c0_i32_0 = arith.constant 0 : i32
    %c0_i32_1 = arith.constant 0 : i32
    %c0_i32_2 = arith.constant 0 : i32
    return %c0_i32, %c0_i32_0, %c0_i32_1 : i32, i32, i32
  }
  func.func @transform_7(%arg0: i32) -> (i32, i32) {
    %c0_i32 = arith.constant 0 : i32
    %c0_i32_0 = arith.constant 0 : i32
    %c0_i32_1 = arith.constant 0 : i32
    return %c0_i32, %c0_i32_0 : i32, i32
  }
  func.func @transform_8(%arg0: i32) -> (i32, i32, i32, i32) {
    %c0_i32 = arith.constant 0 : i32
    %c0_i32_0 = arith.constant 0 : i32
    %c0_i32_1 = arith.constant 0 : i32
    %c0_i32_2 = arith.constant 0 : i32
    return %arg0, %c0_i32, %c0_i32_0, %c0_i32_1 : i32, i32, i32, i32
  }
}

</mosaic_0001>

<bundles_post_ra>
// kernel: tile.19
= control target key start
LH: loop header
LB: loop body
LE: loop exit
PB: predicated region body
PF: predicated region fallthrough
CT: control target
= control target key end

     0   :  { %vm7_vm0 = vcmask 31744   ;;  %vm13_vm1 = vcmask 64544   ;;  %s39_s0 = inlined_call_operand.vmem [shape: f32[2,4], index: 0, kind: input, shape index: {}]   ;;  %s40_s1 = inlined_call_operand.vmem [shape: f32[1,1,8], index: 1, kind: output, shape index: {}]  }
   0x1   :  { %v4_v0 = vld [vmem:[%s39_s0] sm:$0x3]  ;;  %s22_s0 = smov 4  }
   0x2   :  { %5 = vst [vmem:[#allocation1] sm:$0x3] %v4_v0 }
   0x9   :  { %v10_v1 = vld [vmem:[#allocation1 + $0x1] sm:$0x1]   ;;  %v6_v2 = vld [vmem:[#allocation1] sm:$0x1]  }
   0xa   :  { %11 = vrot.lane.b32.xlu0 %v10_v1, %s22_s0  ;;  %8 = vst.msk [vmem:[#allocation0] sm:$0x1] %vm7_vm0, %v6_v2  }
  0x7c   :  { %v12_v3 = vpop.permute.xlu0 %11  }
  0x7d   :  { %14 = vst.msk [vmem:[#allocation0] sm:$0x1] %vm13_vm1, %v12_v3  }
  0x84   :  { %v18_v4 = vld [vmem:[#allocation0] sm:$0x1] }
  0x85   :  { %20 = vst [vmem:[%s40_s1] sm:$0x1] %v18_v4 }

// kernel: tile.17
= control target key start
LH: loop header
LB: loop body
LE: loop exit
PB: predicated region body
PF: predicated region fallthrough
CT: control target
= control target key end

     0   :  { %2 = vsyncpa [#allocation1], 0  ;;  %s44_s6 = smov [#allocation0]   ;;  %s70_s0 = inlined_call_operand.hbm [shape: f32[4], index: 0, kind: input, shape index: {}]   ;;  %s71_s1 = inlined_call_operand.vmem [shape: f32[2,4], index: 1, kind: output, shape index: {}]  }
   0x1   :  { %s9_s7 = sshll.u32 %s44_s6, 4  ;;  %s20_s10 = scalar_lea.hbm %s70_s0, 16  ;;  %s10_s7 = int_to_ptr.vmem [resolvable:$true] %s9_s7 }
   0x2   :  { %p21_p0 = scmp.ne.s32.totalorder %s70_s0, %s20_s10  ;;  %p24_p1 = scmp.lt.u32.totalorder %s20_s10, %s70_s0 }
   0x4   :  { %p26_p2 = pnand %p24_p1, %p21_p0 }
   0x6   :  { %29 = shalt.err (!%p26_p2)
}
   0x7   :  { %s30_s15 = scalar_lea.vmem %s10_s7, 16  ;;  %s34_s16 = scalar_lea.vmem %s10_s7, 32 }
   0x8   :  { %p31_p3 = scmp.ne.s32.totalorder %s10_s7, %s30_s15  ;;  %p35_p4 = scmp.lt.s32.totalorder %s10_s7, %s10_s7 }
   0x9   :  { %p36_p5 = scmp.lt.s32.totalorder %s34_s16, %s30_s15 }
   0xb   :  { %p37_p6 = por %p36_p5, %p35_p4 }
   0xd   :  { %p38_p7 = pnand %p37_p6, %p31_p3 }
   0xf   :  { %41 = shalt.err (!%p38_p7)
}
  0x10   :  { %12 = dma.hbm_to_vmem [thread:$0]  %s70_s0, 16, %s10_s7, [#allocation1]  }
  0x11   :  { %42 = dma.done.wait [#allocation1], 16  }
  0x12   :  { %43 = vsyncadd [#allocation1], 4294967280  ;;  %v16_v0 = vld [vmem:[#allocation0] ss:$0 sm:$0xff] }
  0x13   :  { %17 = vst [vmem:[%s71_s1] sm:$0x3] %v16_v0 }
  0x14   :  { %18 = vsyncpa [#allocation1], 1 }

// kernel: block_forward.1
= control target key start
LH: loop header
LB: loop body
LE: loop exit
PB: predicated region body
PF: predicated region fallthrough
CT: control target
= control target key end

     0   :  { %vm172_vm0 = vcmask 31744   ;;  %vm174_vm1 = vcmask 24576   ;;  %v6395_v3 = vmov 0.0   ;;  %vm595_vm2 = vcmask 1041408   ;;  %s4812_s13 = smov 124   ;;  %s6386_s0 = inlined_call_operand.vmem [shape: f32[2,16,8,8], index: 0, kind: input, shape index: {}]   ;;  %s6387_s1 = inlined_call_operand.vmem [shape: f32[1,1,8], index: 1, kind: input, shape index: {}]   ;;  %s6388_s2 = inlined_call_operand.vmem [shape: f32[1,1,8], index: 2, kind: input, shape index: {}]   ;;  %s6389_s3 = inlined_call_operand.vmem [shape: bf16[9,4,8], index: 3, kind: input, shape index: {}]   ;;  %s6390_s6 = inlined_call_operand.vmem [shape: bf16[9,8,8], index: 6, kind: input, shape index: {}]   ;;  %s6391_s4 = inlined_call_operand.vmem [shape: f32[1,8], index: 4, kind: input, shape index: {}]   ;;  %s6392_s5 = inlined_call_operand.vmem [shape: f32[1,8], index: 5, kind: input, shape index: {}]   ;;  %s6393_s7 = inlined_call_operand.vmem [shape: bf16[4,8], index: 7, kind: input, shape index: {}]   ;;  %s6394_s8 = inlined_call_operand.vmem [shape: f32[2,8,8,8], index: 8, kind: output, shape index: {}]  }
   0x1   :  { %v35_v0 = vld [vmem:[%s6386_s0 + $0x28] sm:$0xff]  ;;  %v4864_v1 = vld [vmem:[%s6387_s1] ss:$0 sm:$0xff]  ;;  %376 = vst.msk [vmem:[#allocation3] sm:$0xff] %vm172_vm0, %v6395_v3  ;;  %173 = vst.msk [vmem:[#allocation2] sm:$0xff] %vm172_vm0, %v6395_v3  ;;  %vm852_vm3 = vcmask 1046528  }
   0x2   :  { %v4869_v2 = vld [vmem:[%s6388_s2] ss:$0 sm:$0xff]  ;;  %176 = vst.msk [vmem:[#allocation2 + $0x120] sm:$0xff] %vm172_vm0, %v6395_v3  ;;  %378 = vst.msk [vmem:[#allocation3 + $0x120] sm:$0xff] %vm172_vm0, %v6395_v3  ;;  %v74_v4 = vmul.f32 %v4864_v1, %v35_v0  ;;  %v31_v5 = vld [vmem:[%s6386_s0 + $0x8] sm:$0xff]  ;;  %vm2075_vm4 = vcmask 64512  }
   0x3   :  { %185 = vst.msk [vmem:[#allocation2 + $0x20] sm:$0x1] %vm174_vm1, %v6395_v3  ;;  %175 = vst.msk [vmem:[#allocation2 + $0x8] sm:$0x1] %vm174_vm1, %v6395_v3  ;;  %v37_v6 = vld [vmem:[%s6386_s0 + $0x38] sm:$0xff]  ;;  %v70_v8 = vmul.f32 %v4864_v1, %v31_v5  ;;  %v39_v12 = vld [vmem:[%s6386_s0 + $0x48] sm:$0xff] }
   0x4   :  { %177 = vst.msk [vmem:[#allocation2 + $0x128] sm:$0x1] %vm174_vm1, %v6395_v3  ;;  %184 = vst.msk [vmem:[#allocation2 + $0x10] sm:$0x1] %vm174_vm1, %v6395_v3  ;;  %v33_v7 = vld [vmem:[%s6386_s0 + $0x18] sm:$0xff]  ;;  %v76_v9 = vmul.f32 %v4864_v1, %v37_v6  ;;  %v47_v13 = vld [vmem:[%s6386_s0 + $0x88] sm:$0xff]  ;;  %v113_v14 = vadd.f32 %v4869_v2, %v74_v4  ;;  %v78_v16 = vmul.f32 %v4864_v1, %v39_v12 }
   0x5   :  { %186 = vst.msk [vmem:[#allocation2 + $0x30] sm:$0x1] %vm174_vm1, %v6395_v3  ;;  %187 = vst.msk [vmem:[#allocation2 + $0x40] sm:$0x1] %vm174_vm1, %v6395_v3  ;;  %v72_v10 = vmul.f32 %v4864_v1, %v33_v7  ;;  %v41_v11 = vld [vmem:[%s6386_s0 + $0x58] sm:$0xff]  ;;  %v86_v17 = vmul.f32 %v4864_v1, %v47_v13  ;;  %v43_v18 = vld [vmem:[%s6386_s0 + $0x68] sm:$0xff]  ;;  %v109_v19 = vadd.f32 %v4869_v2, %v70_v8 }
   0x6   :  { %188 = vst.msk [vmem:[#allocation2 + $0x50] sm:$0x1] %vm174_vm1, %v6395_v3  ;;  %189 = vst.msk [vmem:[#allocation2 + $0x60] sm:$0x1] %vm174_vm1, %v6395_v3  ;;  %v80_v15 = vmul.f32 %v4864_v1, %v41_v11  ;;  %v115_v20 = vadd.f32 %v4869_v2, %v76_v9  ;;  %v82_v22 = vmul.f32 %v4864_v1, %v43_v18  ;;  %v51_v23 = vld [vmem:[%s6386_s0 + $0xa8] sm:$0xff]  ;;  %v145_v24 = vmax.f32 %v113_v14, 0.0 }
   0x7   :  { %190 = vst.msk [vmem:[#allocation2 + $0x70] sm:$0x1] %vm174_vm1, %v6395_v3  ;;  %191 = vst.msk [vmem:[#allocation2 + $0x80] sm:$0x1] %vm174_vm1, %v6395_v3  ;;  %v111_v21 = vadd.f32 %v4869_v2, %v72_v10  ;;  %v4987_v26 = vadd.f32 %v4869_v2, %v78_v16  ;;  %v4990_v27 = vadd.f32 %v4869_v2, %v86_v17  ;;  %v49_v28 = vld [vmem:[%s6386_s0 + $0x98] sm:$0xff]  ;;  %v55_v29 = vld [vmem:[%s6386_s0 + $0xc8] sm:$0xff] }
   0x8   :  { %192 = vst.msk [vmem:[#allocation2 + $0x90] sm:$0x1] %vm174_vm1, %v6395_v3  ;;  %193 = vst.msk [vmem:[#allocation2 + $0xa0] sm:$0x1] %vm174_vm1, %v6395_v3  ;;  %v4984_v25 = vadd.f32 %v4869_v2, %v80_v15  ;;  %v53_v30 = vld [vmem:[%s6386_s0 + $0xb8] sm:$0xff]  ;;  %v141_v31 = vmax.f32 %v109_v19, 0.0  ;;  %v5002_v34 = vadd.f32 %v4869_v2, %v82_v22  ;;  %258 = vrot.lane.b32.xlu1 %v145_v24, %s4812_s13 }
   0x9   :  { %194 = vst.msk [vmem:[#allocation2 + $0xb0] sm:$0x1] %vm174_vm1, %v6395_v3  ;;  %195 = vst.msk [vmem:[#allocation2 + $0xc0] sm:$0x1] %vm174_vm1, %v6395_v3  ;;  %v147_v32 = vmax.f32 %v115_v20, 0.0  ;;  %v143_v33 = vmax.f32 %v111_v21, 0.0  ;;  %v90_v41 = vmul.f32 %v4864_v1, %v51_v23  ;;  %v88_v44 = vmul.f32 %v4864_v1, %v49_v28 }
   0xa   :  { %196 = vst.msk [vmem:[#allocation2 + $0xd0] sm:$0x1] %vm174_vm1, %v6395_v3  ;;  %197 = vst.msk [vmem:[#allocation2 + $0xe0] sm:$0x1] %vm174_vm1, %v6395_v3  ;;  %v59_v35 = vld [vmem:[%s6386_s0 + $0xe8] sm:$0xff]  ;;  %v57_v36 = vld [vmem:[%s6386_s0 + $0xd8] sm:$0xff]  ;;  %250 = vrot.lane.b32.xlu0 %v141_v31, %s4812_s13  ;;  %v94_v45 = vmul.f32 %v4864_v1, %v55_v29  ;;  %v92_v46 = vmul.f32 %v4864_v1, %v53_v30 }
   0xb   :  { %198 = vst.msk [vmem:[#allocation2 + $0xf0] sm:$0x1] %vm174_vm1, %v6395_v3  ;;  %199 = vst.msk [vmem:[#allocation2 + $0x100] sm:$0x1] %vm174_vm1, %v6395_v3  ;;  %v32_v37 = vld [vmem:[%s6386_s0 + $0x10] sm:$0xff]  ;;  %v151_v38 = vmax.f32 %v4984_v25, 0.0  ;;  %v5038_v47 = vadd.f32 %v4869_v2, %v90_v41  ;;  %v98_v48 = vmul.f32 %v4864_v1, %v59_v35  ;;  %v96_v49 = vmul.f32 %v4864_v1, %v57_v36 }
   0xc   :  { %200 = vst.msk [vmem:[#allocation2 + $0x130] sm:$0x1] %vm174_vm1, %v6395_v3  ;;  %201 = vst.msk [vmem:[#allocation2 + $0x140] sm:$0x1] %vm174_vm1, %v6395_v3  ;;  %v149_v39 = vmax.f32 %v4987_v26, 0.0  ;;  %v157_v40 = vmax.f32 %v4990_v27, 0.0  ;;  %v71_v50 = vmul.f32 %v4864_v1, %v32_v37  ;;  %v5047_v51 = vadd.f32 %v4869_v2, %v88_v44  ;;  %262 = vrot.lane.b32.xlu1 %v147_v32, %s4812_s13 }
   0xd   :  { %202 = vst.msk [vmem:[#allocation2 + $0x150] sm:$0x1] %vm174_vm1, %v6395_v3  ;;  %203 = vst.msk [vmem:[#allocation2 + $0x160] sm:$0x1] %vm174_vm1, %v6395_v3  ;;  %v30_v42 = vld [vmem:[%s6386_s0] sm:$0xff]  ;;  %v153_v43 = vmax.f32 %v5002_v34, 0.0  ;;  %v5050_v52 = vadd.f32 %v4869_v2, %v94_v45  ;;  %v5053_v53 = vadd.f32 %v4869_v2, %v92_v46  ;;  %v5065_v58 = vadd.f32 %v4869_v2, %v98_v48 }
   0xe   :  { %204 = vst.msk [vmem:[#allocation2 + $0x170] sm:$0x1] %vm174_vm1, %v6395_v3  ;;  %205 = vst.msk [vmem:[#allocation2 + $0x180] sm:$0x1] %vm174_vm1, %v6395_v3  ;;  %v69_v54 = vmul.f32 %v4864_v1, %v30_v42  ;;  %v36_v55 = vld [vmem:[%s6386_s0 + $0x30] sm:$0xff]  ;;  %v34_v56 = vld [vmem:[%s6386_s0 + $0x20] sm:$0xff]  ;;  %v5068_v59 = vadd.f32 %v4869_v2, %v96_v49  ;;  %v110_v60 = vadd.f32 %v4869_v2, %v71_v50  ;;  %254 = vrot.lane.b32.xlu0 %v143_v33, %s4812_s13 }
   0xf   :  { %206 = vst.msk [vmem:[#allocation2 + $0x190] sm:$0x1] %vm174_vm1, %v6395_v3  ;;  %207 = vst.msk [vmem:[#allocation2 + $0x1a0] sm:$0x1] %vm174_vm1, %v6395_v3  ;;  %v161_v57 = vmax.f32 %v5038_v47, 0.0  ;;  %v40_v61 = vld [vmem:[%s6386_s0 + $0x50] sm:$0xff]  ;;  %v75_v13 = vmul.f32 %v4864_v1, %v36_v55  ;;  %v73_v16 = vmul.f32 %v4864_v1, %v34_v56 }
  0x10   :  { %208 = vst.msk [vmem:[#allocation2 + $0x1b0] sm:$0x1] %vm174_vm1, %v6395_v3  ;;  %209 = vst.msk [vmem:[#allocation2 + $0x1c0] sm:$0x1] %vm174_vm1, %v6395_v3  ;;  %v38_v62 = vld [vmem:[%s6386_s0 + $0x40] sm:$0xff]  ;;  %v159_v0 = vmax.f32 %v5047_v51, 0.0  ;;  %v108_v6 = vadd.f32 %v4869_v2, %v69_v54  ;;  %v79_v17 = vmul.f32 %v4864_v1, %v40_v61  ;;  %270 = vrot.lane.b32.xlu1 %v151_v38, %s4812_s13 }
  0x11   :  { %210 = vst.msk [vmem:[#allocation2 + $0x1d0] sm:$0x1] %vm174_vm1, %v6395_v3  ;;  %211 = vst.msk [vmem:[#allocation2 + $0x1e0] sm:$0x1] %vm174_vm1, %v6395_v3  ;;  %v5080_v63 = vld [vmem:[%s6389_s3 + $0x2] sm:$0x3]  ;;  %v77_v18 = vmul.f32 %v4864_v1, %v38_v62  ;;  %v114_v19 = vadd.f32 %v4869_v2, %v75_v13  ;;  %v112_v23 = vadd.f32 %v4869_v2, %v73_v16 }
  0x12   :  { %212 = vst.msk [vmem:[#allocation2 + $0x1f0] sm:$0x1] %vm174_vm1, %v6395_v3  ;;  %213 = vst.msk [vmem:[#allocation2 + $0x200] sm:$0x1] %vm174_vm1, %v6395_v3  ;;  %v165_v4 = vmax.f32 %v5050_v52, 0.0  ;;  %v163_v5 = vmax.f32 %v5053_v53, 0.0  ;;  %4789 = vmatprep.subr.msk.bf16.mxu0 %vm595_vm2, %v5080_v63  ;;  %266 = vrot.lane.b32.xlu0 %v149_v39, %s4812_s13 }
  0x13   :  { %214 = vst.msk [vmem:[#allocation2 + $0x210] sm:$0x1] %vm174_vm1, %v6395_v3  ;;  %215 = vst.msk [vmem:[#allocation2 + $0x220] sm:$0x1] %vm174_vm1, %v6395_v3  ;;  %v44_v7 = vld [vmem:[%s6386_s0 + $0x70] sm:$0xff]  ;;  %v42_v8 = vld [vmem:[%s6386_s0 + $0x60] sm:$0xff]  ;;  %v116_v25 = vadd.f32 %v4869_v2, %v77_v18 }
  0x14   :  { %423 = vst.msk [vmem:[#allocation3 + $0x60] sm:$0xff] %vm172_vm0, %v145_v24  ;;  %419 = vst.msk [vmem:[#allocation3 + $0x20] sm:$0xff] %vm172_vm0, %v141_v31  ;;  %v48_v9 = vld [vmem:[%s6386_s0 + $0x90] sm:$0xff]  ;;  %v169_v10 = vmax.f32 %v5065_v58, 0.0  ;;  %v167_v11 = vmax.f32 %v5068_v59, 0.0  ;;  %v5103_v12 = vmax.f32 %v110_v60, 0.0  ;;  %v83_v20 = vmul.f32 %v4864_v1, %v44_v7  ;;  %282 = vrot.lane.b32.xlu1 %v157_v40, %s4812_s13 }
  0x15   :  { %425 = vst.msk [vmem:[#allocation3 + $0x80] sm:$0xff] %vm172_vm0, %v147_v32  ;;  %421 = vst.msk [vmem:[#allocation3 + $0x40] sm:$0xff] %vm172_vm0, %v143_v33  ;;  %v46_v14 = vld [vmem:[%s6386_s0 + $0x80] sm:$0xff]  ;;  %v5118_v15 = vmax.f32 %v108_v6, 0.0  ;;  %v81_v21 = vmul.f32 %v4864_v1, %v42_v8  ;;  %v87_v22 = vmul.f32 %v4864_v1, %v48_v9  ;;  %v118_v24 = vadd.f32 %v4869_v2, %v79_v17  ;;  %v52_v29 = vld [vmem:[%s6386_s0 + $0xb0] sm:$0xff] }
  0x16   :  { %429 = vst.msk [vmem:[#allocation3 + $0xc0] sm:$0xff] %vm172_vm0, %v151_v38  ;;  %427 = vst.msk [vmem:[#allocation3 + $0xa0] sm:$0xff] %vm172_vm0, %v149_v39  ;;  %v85_v28 = vmul.f32 %v4864_v1, %v46_v14  ;;  %v5148_v30 = vmax.f32 %v114_v19, 0.0  ;;  %v122_v26 = vadd.f32 %v4869_v2, %v83_v20  ;;  %v50_v33 = vld [vmem:[%s6386_s0 + $0xa0] sm:$0xff]  ;;  %v56_v35 = vld [vmem:[%s6386_s0 + $0xd0] sm:$0xff]  ;;  %v5159_v36 = vmax.f32 %v112_v23, 0.0  ;;  %274 = vrot.lane.b32.xlu0 %v153_v43, %s4812_s13 }
  0x17   :  { %435 = vst.msk [vmem:[#allocation3 + $0x140] sm:$0xff] %vm172_vm0, %v157_v40  ;;  %431 = vst.msk [vmem:[#allocation3 + $0xe0] sm:$0xff] %vm172_vm0, %v153_v43  ;;  %v120_v31 = vadd.f32 %v4869_v2, %v81_v21  ;;  %v126_v32 = vadd.f32 %v4869_v2, %v87_v22  ;;  %v5161_v37 = vmax.f32 %v118_v24, 0.0  ;;  %v5163_v38 = vmax.f32 %v116_v25, 0.0  ;;  %v54_v41 = vld [vmem:[%s6386_s0 + $0xc0] sm:$0xff]  ;;  %v60_v42 = vld [vmem:[%s6386_s0 + $0xf0] sm:$0xff] }
  0x18   :  { %439 = vst.msk [vmem:[#allocation3 + $0x180] sm:$0xff] %vm172_vm0, %v161_v57  ;;  %6429 = vst [vmem:[#allocation5_spill] sm:$0xff] %v5103_v12  ;;  %v124_v39 = vadd.f32 %v4869_v2, %v85_v28  ;;  %v58_v44 = vld [vmem:[%s6386_s0 + $0xe0] sm:$0xff]  ;;  %v5180_v45 = vmax.f32 %v122_v26, 0.0  ;;  %v91_v49 = vmul.f32 %v4864_v1, %v52_v29  ;;  %v61_v50 = vld [vmem:[%s6386_s0 + $0xf8] sm:$0xff]  ;;  %v89_v55 = vmul.f32 %v4864_v1, %v50_v33 }
  0x19   :  { %437 = vst.msk [vmem:[#allocation3 + $0x160] sm:$0xff] %vm172_vm0, %v159_v0  ;;  %443 = vst.msk [vmem:[#allocation3 + $0x1c0] sm:$0xff] %vm172_vm0, %v165_v4  ;;  %v5182_v46 = vmax.f32 %v120_v31, 0.0  ;;  %v5184_v48 = vmax.f32 %v126_v32, 0.0  ;;  %v45_v27 = vld [vmem:[%s6386_s0 + $0x78] sm:$0xff]  ;;  %v95_v56 = vmul.f32 %v4864_v1, %v56_v35  ;;  %v93_v43 = vmul.f32 %v4864_v1, %v54_v41  ;;  %v518_v9 = vld [vmem:[#allocation3] sm:$0xff]  ;;  %290 = vrot.lane.b32.xlu1 %v161_v57, %s4812_s13 }
  0x1a   :  { %441 = vst.msk [vmem:[#allocation3 + $0x1a0] sm:$0xff] %vm172_vm0, %v163_v5  ;;  %6430 = vst [vmem:[#allocation6_spill] sm:$0xff] %v5118_v15  ;;  %v5204_v54 = vmax.f32 %v124_v39, 0.0  ;;  %v130_v34 = vadd.f32 %v4869_v2, %v91_v49  ;;  %v99_v60 = vmul.f32 %v4864_v1, %v60_v42  ;;  %v97_v61 = vmul.f32 %v4864_v1, %v58_v44  ;;  %v560_v23 = vld [vmem:[%s6389_s3] sm:$0x3] }
  0x1b   :  { %447 = vst.msk [vmem:[#allocation3 + $0x200] sm:$0xff] %vm172_vm0, %v169_v10  ;;  %445 = vst.msk [vmem:[#allocation3 + $0x1e0] sm:$0xff] %vm172_vm0, %v167_v11  ;;  %v128_v62 = vadd.f32 %v4869_v2, %v89_v55  ;;  %v134_v6 = vadd.f32 %v4869_v2, %v95_v56  ;;  %v100_v7 = vmul.f32 %v4864_v1, %v61_v50  ;;  %v5232_v18 = vld [vmem:[#allocation3 + $0x20] sm:$0xff]  ;;  %286 = vrot.lane.b32.xlu0 %v159_v0, %s4812_s13  ;;  %vm2087_vm5 = vcmask 57344  }
  0x1c   :  { %420 = vst.msk [vmem:[#allocation3 + $0x30] sm:$0xff] %vm172_vm0, %v5103_v12  ;;  %418 = vst.msk [vmem:[#allocation3 + $0x10] sm:$0xff] %vm172_vm0, %v5118_v15  ;;  %v84_v8 = vmul.f32 %v4864_v1, %v45_v27  ;;  %v5227_v13 = vmax.f32 %v130_v34, 0.0  ;;  %v132_v14 = vadd.f32 %v4869_v2, %v93_v43  ;;  %v138_v16 = vadd.f32 %v4869_v2, %v99_v60  ;;  %v5234_v19 = vld [vmem:[#allocation3 + $0x40] sm:$0xff] }
  0x1d   :  { %6431 = vst [vmem:[#allocation7_spill] sm:$0xff] %v5148_v30  ;;  %6432 = vst [vmem:[#allocation8_spill] sm:$0xff] %v5159_v36  ;;  %v136_v17 = vadd.f32 %v4869_v2, %v97_v61  ;;  %v5236_v20 = vld [vmem:[#allocation3 + $0x60] sm:$0xff]  ;;  %v5241_v1 = vmax.f32 %v128_v62, 0.0  ;;  %v5243_v47 = vmax.f32 %v134_v6, 0.0  ;;  %v5246_v57 = vadd.f32 %v4869_v2, %v100_v7  ;;  %298 = vrot.lane.b32.xlu1 %v165_v4, %s4812_s13 }
  0x1e   :  { %6433 = vst [vmem:[#allocation9_spill] sm:$0xff] %v5161_v37  ;;  %6434 = vst [vmem:[#allocation10_spill] sm:$0xff] %v5163_v38  ;;  %v5249_v21 = vadd.f32 %v4869_v2, %v84_v8  ;;  %v5251_v22 = vld [vmem:[#allocation3 + $0x80] sm:$0xff]  ;;  %v5260_v51 = vmax.f32 %v132_v14, 0.0  ;;  %v5262_v0 = vmax.f32 %v138_v16, 0.0  ;;  %v597_v2 = vsel %vm595_vm2, %v5080_v63, 0 }
  0x1f   :  { %424 = vst.msk [vmem:[#allocation3 + $0x70] sm:$0xff] %vm172_vm0, %v5148_v30  ;;  %6435 = vst [vmem:[#allocation11_spill] sm:$0xff] %v5180_v45  ;;  %v5256_v24 = vld [vmem:[#allocation3 + $0xa0] sm:$0xff]  ;;  %v5264_v25 = vmax.f32 %v136_v17, 0.0  ;;  %v171_v28 = vmax.f32 %v5246_v57, 0.0  ;;  %4174 = vmatpush3.bf16.msra.mxu0 %v597_v2  ;;  %v561_v26 = vpack.c.bf16 %v5232_v18, %v518_v9  ;;  %v562_v31 = vpack.c.bf16 %v5236_v20, %v5234_v19 }
  0x20   :  { %6436 = vst [vmem:[#allocation12_spill] sm:$0xff] %v5182_v46  ;;  %6437 = vst [vmem:[#allocation13_spill] sm:$0xff] %v5184_v48  ;;  %v155_v29 = vmax.f32 %v5249_v21, 0.0  ;;  %4790 = vmatprep.subr.msk.bf16.mxu0 %vm595_vm2, %v560_v23  ;;  %v721_v52 = vsel %vm595_vm2, %v560_v23, 0  ;;  %v563_v4 = vpack.c.bf16 %v5256_v24, %v5251_v22  ;;  %294 = vrot.lane.b32.xlu0 %v163_v5, %s4812_s13  ;;  %v5303_v33 = vld [vmem:[%s6389_s3 + $0x4] sm:$0x3] }
  0x21   :  { %422 = vst.msk [vmem:[#allocation3 + $0x50] sm:$0xff] %vm172_vm0, %v5159_v36  ;;  %428 = vst.msk [vmem:[#allocation3 + $0xb0] sm:$0xff] %vm172_vm0, %v5161_v37  ;;  %4175 = vmatprep.mubr.msk.bf16.mxu0 %vm172_vm0, %v561_v26  ;;  %v5307_v35 = vld [vmem:[#allocation3 + $0xc0] sm:$0xff]  ;;  %306 = vrot.lane.b32.xlu1 %v169_v10, %s4812_s13  ;;  %v952_v21 = vsel %vm595_vm2, %v5303_v33, 0  ;;  %vm2077_vm6 = vcmask 58368   ;;  %vm2273_vm7 = vcmask 1043456  }
  0x22   :  { %426 = vst.msk [vmem:[#allocation3 + $0x90] sm:$0xff] %vm172_vm0, %v5163_v38  ;;  %6438 = vst [vmem:[#allocation14_spill] sm:$0xff] %v5204_v54  ;;  %4176 = vmatmul.mubr.msk.bf16.vlgmr.msra.gmra.mrb[0].mxu0 %vm172_vm0, %v562_v31  ;;  %v5309_v53 = vld [vmem:[#allocation3 + $0xe0] sm:$0xff] }
  0x23   :  { %432 = vst.msk [vmem:[#allocation3 + $0xf0] sm:$0xff] %vm172_vm0, %v5180_v45  ;;  %430 = vst.msk [vmem:[#allocation3 + $0xd0] sm:$0xff] %vm172_vm0, %v5182_v46  ;;  %4192 = vmatpush3.bf16.msra.mxu0 %v721_v52  ;;  %4179 = vmatprep.mubr.msk.bf16.mxu0 %vm172_vm0, %v563_v4  ;;  %v535_v5 = vld [vmem:[#allocation3 + $0x120] sm:$0xff]  ;;  %v564_v41 = vpack.c.bf16 %v5309_v53, %v5307_v35 }
  0x24   :  { %436 = vst.msk [vmem:[#allocation3 + $0x150] sm:$0xff] %vm172_vm0, %v5184_v48  ;;  %434 = vst.msk [vmem:[#allocation3 + $0x130] sm:$0xff] %vm172_vm0, %v5204_v54  ;;  %v5314_v39 = vld [vmem:[#allocation3 + $0x140] sm:$0xff]  ;;  %4791 = vmatprep.subr.msk.bf16.mxu0 %vm595_vm2, %v5303_v33  ;;  %302 = vrot.lane.b32.xlu0 %v167_v11, %s4812_s13 }
  0x25   :  { %6439 = vst [vmem:[#allocation15_spill] sm:$0xff] %v5227_v13  ;;  %6440 = vst [vmem:[#allocation16_spill] sm:$0xff] %v5241_v1  ;;  %v565_v42 = vpack.c.bf16 %v5314_v39, %v535_v5  ;;  %252 = vrot.lane.b32.xlu1 %v5103_v12, %s4812_s13  ;;  %v5330_v58 = vld [vmem:[#allocation3 + $0x160] sm:$0xff]  ;;  %v521_v12 = vld [vmem:[#allocation3 + $0x30] sm:$0xff] }
  0x26   :  { %6441 = vst [vmem:[#allocation17_spill] sm:$0xff] %v5243_v47  ;;  %440 = vst.msk [vmem:[#allocation3 + $0x190] sm:$0xff] %vm172_vm0, %v5227_v13  ;;  %v5332_v10 = vld [vmem:[#allocation3 + $0x180] sm:$0xff] }
  0x27   :  { %6442 = vst [vmem:[#allocation18_spill] sm:$0xff] %v5260_v51  ;;  %6443 = vst [vmem:[#allocation19_spill] sm:$0xff] %v5262_v0  ;;  %v5336_v59 = vld [vmem:[#allocation3 + $0x1a0] sm:$0xff]  ;;  %v566_v44 = vpack.c.bf16 %v5332_v10, %v5330_v58 }
  0x28   :  { %6444 = vst [vmem:[#allocation20_spill] sm:$0xff] %v5264_v25  ;;  %438 = vst.msk [vmem:[#allocation3 + $0x170] sm:$0xff] %vm172_vm0, %v5241_v1  ;;  %248 = vrot.lane.b32.xlu0 %v5118_v15, %s4812_s13  ;;  %v5338_v11 = vld [vmem:[#allocation3 + $0x1c0] sm:$0xff] }
  0x29   :  { %444 = vst.msk [vmem:[#allocation3 + $0x1d0] sm:$0xff] %vm172_vm0, %v5243_v47  ;;  %442 = vst.msk [vmem:[#allocation3 + $0x1b0] sm:$0xff] %vm172_vm0, %v5260_v51  ;;  %260 = vrot.lane.b32.xlu1 %v5148_v30, %s4812_s13  ;;  %v567_v49 = vpack.c.bf16 %v5338_v11, %v5336_v59  ;;  %v5352_v50 = vld [vmem:[#allocation3 + $0x1e0] sm:$0xff] }
  0x2a   :  { %448 = vst.msk [vmem:[#allocation3 + $0x210] sm:$0xff] %vm172_vm0, %v5262_v0  ;;  %446 = vst.msk [vmem:[#allocation3 + $0x1f0] sm:$0xff] %vm172_vm0, %v5264_v25  ;;  %4180 = vmatmul.mubr.msk.bf16.gmra.mrb[4].mxu0 %vm172_vm0, %v564_v41  ;;  %v5354_v27 = vld [vmem:[#allocation3 + $0x200] sm:$0xff] }
  0x2b   :  { %449 = vst.msk [vmem:[#allocation3 + $0x220] sm:$0xff] %vm172_vm0, %v171_v28  ;;  %433 = vst.msk [vmem:[#allocation3 + $0x100] sm:$0xff] %vm172_vm0, %v155_v29  ;;  %4183 = vmatprep.mubr.msk.bf16.mxu0 %vm172_vm0, %v565_v42  ;;  %v568_v55 = vpack.c.bf16 %v5354_v27, %v5352_v50  ;;  %v5385_v61 = vld [vmem:[#allocation2] sm:$0xff] }
  0x2c   :  { %256 = vrot.lane.b32.xlu0 %v5159_v36, %s4812_s13 }
  0x2d   :  { %268 = vrot.lane.b32.xlu1 %v5161_v37, %s4812_s13 }
  0x30   :  { %264 = vrot.lane.b32.xlu0 %v5163_v38, %s4812_s13  ;;  %v519_v38 = vld [vmem:[#allocation3 + $0x10] sm:$0xff] }
  0x31   :  { %276 = vrot.lane.b32.xlu1 %v5180_v45, %s4812_s13 }
  0x32   :  { %4184 = vmatmul.mubr.msk.bf16.gmra.mrb[8].mxu0 %vm172_vm0, %v566_v44 }
  0x33   :  { %4187 = vmatprep.mubr.msk.bf16.mxu0 %vm172_vm0, %v567_v49 }
  0x34   :  { %272 = vrot.lane.b32.xlu0 %v5182_v46, %s4812_s13 }
  0x35   :  { %284 = vrot.lane.b32.xlu1 %v5184_v48, %s4812_s13 }
  0x38   :  { %280 = vrot.lane.b32.xlu0 %v5204_v54, %s4812_s13 }
  0x39   :  { %292 = vrot.lane.b32.xlu1 %v5227_v13, %s4812_s13  ;;  %v853_v13 = vrot.slane %v5385_v61, 1 }
  0x3a   :  { %4188 = vmatmul.mubr.msk.bf16.gmra.mrb[12].mxu0 %vm172_vm0, %v568_v55 }
  0x3c   :  { %288 = vrot.lane.b32.xlu0 %v5241_v1, %s4812_s13 }
  0x3d   :  { %300 = vrot.lane.b32.xlu1 %v5243_v47, %s4812_s13 }
  0x40   :  { %296 = vrot.lane.b32.xlu0 %v5260_v51, %s4812_s13 }
  0x41   :  { %308 = vrot.lane.b32.xlu1 %v5262_v0, %s4812_s13 }
  0x44   :  { %304 = vrot.lane.b32.xlu0 %v5264_v25, %s4812_s13 }
  0x45   :  { %310 = vrot.lane.b32.xlu1 %v171_v28, %s4812_s13 }
  0x48   :  { %278 = vrot.lane.b32.xlu0 %v155_v29, %s4812_s13 }
  0x7a   :  { %v259_v56 = vpop.permute.xlu1 %258 }
  0x7b   :  { %349 = vst.msk [vmem:[#allocation2 + $0x61] sm:$0xff] %vm172_vm0, %v259_v56  ;;  %v451_v56 = vld [vmem:[#allocation2 + $0x8] sm:$0x1] }
  0x7c   :  { %v251_v34 = vpop.permute.xlu0 %250 }
  0x7d   :  { %345 = vst.msk [vmem:[#allocation2 + $0x21] sm:$0xff] %vm172_vm0, %v251_v34  ;;  %v5420_v34 = vld [vmem:[%s6389_s3 + $0x6] sm:$0x3] }
  0x7e   :  { %v263_v43 = vpop.permute.xlu1 %262 }
  0x7f   :  { %351 = vst.msk [vmem:[#allocation2 + $0x81] sm:$0xff] %vm172_vm0, %v263_v43 }
  0x80   :  { %v255_v60 = vpop.permute.xlu0 %254 }
  0x81   :  { %347 = vst.msk [vmem:[#allocation2 + $0x41] sm:$0xff] %vm172_vm0, %v255_v60 }
  0x82   :  { %v271_v62 = vpop.permute.xlu1 %270  ;;  %v5387_v6 = vld [vmem:[#allocation2 + $0x60] sm:$0xff]  ;;  %v463_v7 = vld [vmem:[#allocation2 + $0x68] sm:$0x1] }
  0x83   :  { %355 = vst.msk [vmem:[#allocation2 + $0xc1] sm:$0xff] %vm172_vm0, %v271_v62  ;;  %v862_v14 = vrot.slane %v5387_v6, 1  ;;  %v863_v17 = vrot.slane %v463_v7, 1 }
  0x84   :  { %v267_v8 = vpop.permute.xlu0 %266  ;;  %v5390_v9 = vld [vmem:[#allocation2 + $0x20] sm:$0xff]  ;;  %v455_v16 = vld [vmem:[#allocation2 + $0x28] sm:$0x1] }
  0x85   :  { %353 = vst.msk [vmem:[#allocation2 + $0xa1] sm:$0xff] %vm172_vm0, %v267_v8  ;;  %v552_v57 = vpack.c.bf16 %v5390_v9, %v5385_v61  ;;  %v856_v23 = vrot.slane %v5390_v9, 1  ;;  %v857_v29 = vrot.slane %v455_v16, 1  ;;  %v5409_v41 = vsel %vm852_vm3, %v862_v14, %v863_v17 }
  0x86   :  { %v283_v2 = vpop.permute.xlu1 %282  ;;  %v5400_v28 = vld [vmem:[#allocation2 + $0x80] sm:$0xff]  ;;  %v467_v26 = vld [vmem:[#allocation2 + $0x88] sm:$0x1]  ;;  %6445 = vst [vmem:[#allocation21_spill] sm:$0xff] %v5409_v41 }
  0x87   :  { %4193 = vmatprep.mubr.msk.bf16.mxu0 %vm172_vm0, %v552_v57  ;;  %361 = vst.msk [vmem:[#allocation2 + $0x141] sm:$0xff] %vm172_vm0, %v283_v2  ;;  %v865_v4 = vrot.slane %v5400_v28, 1  ;;  %v866_v42 = vrot.slane %v467_v26, 1  ;;  %v5429_v7 = vsel %vm852_vm3, %v856_v23, %v857_v29 }
  0x88   :  { %v275_v31 = vpop.permute.xlu0 %274  ;;  %v5403_v52 = vld [vmem:[#allocation2 + $0x40] sm:$0xff]  ;;  %v459_v5 = vld [vmem:[#allocation2 + $0x48] sm:$0x1]  ;;  %6447 = vst [vmem:[#allocation23_spill] sm:$0xff] %v5429_v7 }
  0x89   :  { %357 = vst.msk [vmem:[#allocation2 + $0xe1] sm:$0xff] %vm172_vm0, %v275_v31  ;;  %v553_v44 = vpack.c.bf16 %v5387_v6, %v5403_v52  ;;  %v859_v49 = vrot.slane %v5403_v52, 1  ;;  %v860_v55 = vrot.slane %v459_v5, 1  ;;  %v5423_v43 = vsel %vm852_vm3, %v865_v4, %v866_v42 }
  0x8a   :  { %6446 = vst [vmem:[#allocation22_spill] sm:$0xff] %v5423_v43  ;;  %v5426_v62 = vld [vmem:[#allocation2 + $0xc0] sm:$0xff]  ;;  %v475_v16 = vld [vmem:[#allocation2 + $0xc8] sm:$0x1] }
  0x8b   :  { %4194 = vmatmul.mubr.msk.bf16.vlgmr.msra.gmra.mrb[0].mxu0 %vm172_vm0, %v553_v44  ;;  %v291_v60 = vpop.permute.xlu1 %290  ;;  %v5432_v8 = vsel %vm852_vm3, %v859_v49, %v860_v55  ;;  %v871_v2 = vrot.slane %v5426_v62, 1  ;;  %v872_v31 = vrot.slane %v475_v16, 1 }
  0x8c   :  { %4210 = vmatpush3.bf16.msra.mxu0 %v952_v21  ;;  %365 = vst.msk [vmem:[#allocation2 + $0x181] sm:$0xff] %vm172_vm0, %v291_v60  ;;  %v5437_v57 = vld [vmem:[#allocation2 + $0xa0] sm:$0xff]  ;;  %v471_v26 = vld [vmem:[#allocation2 + $0xa8] sm:$0x1] }
  0x8d   :  { %v287_v17 = vpop.permute.xlu0 %286  ;;  %v554_v29 = vpack.c.bf16 %v5437_v57, %v5400_v28  ;;  %v868_v4 = vrot.slane %v5437_v57, 1  ;;  %v5446_v21 = vld [vmem:[#allocation2 + $0x120] sm:$0xff]  ;;  %4792 = vmatprep.subr.msk.bf16.mxu0 %vm595_vm2, %v5420_v34  ;;  %v869_v5 = vrot.slane %v471_v26, 1  ;;  %v5453_v44 = vsel %vm852_vm3, %v871_v2, %v872_v31 }
  0x8e   :  { %363 = vst.msk [vmem:[#allocation2 + $0x161] sm:$0xff] %vm172_vm0, %v287_v17  ;;  %6448 = vst [vmem:[#allocation24_spill] sm:$0xff] %v5453_v44  ;;  %v5456_v55 = vld [vmem:[#allocation2 + $0x140] sm:$0xff]  ;;  %v489_v16 = vld [vmem:[#allocation2 + $0x148] sm:$0x1] }
  0x8f   :  { %4197 = vmatprep.mubr.msk.bf16.mxu0 %vm172_vm0, %v554_v29  ;;  %v299_v49 = vpop.permute.xlu1 %298  ;;  %v5459_v60 = vsel %vm852_vm3, %v868_v4, %v869_v5  ;;  %v556_v26 = vpack.c.bf16 %v5456_v55, %v5446_v21  ;;  %v880_v31 = vrot.slane %v5456_v55, 1  ;;  %v881_v29 = vrot.slane %v489_v16, 1 }
  0x90   :  { %6449 = vst [vmem:[#allocation25_spill] sm:$0xff] %v5459_v60  ;;  %369 = vst.msk [vmem:[#allocation2 + $0x1c1] sm:$0xff] %vm172_vm0, %v299_v49  ;;  %v5462_v40 = vld [vmem:[#allocation2 + $0xe0] sm:$0xff] }
  0x91   :  { %v555_v2 = vpack.c.bf16 %v5462_v40, %v5426_v62 }
  0x92   :  { %v295_v17 = vpop.permute.xlu0 %294 }
  0x93   :  { %367 = vst.msk [vmem:[#allocation2 + $0x1a1] sm:$0xff] %vm172_vm0, %v295_v17  ;;  %4198 = vmatmul.mubr.msk.bf16.gmra.mrb[4].mxu0 %vm172_vm0, %v555_v2  ;;  %v307_v5 = vpop.permute.xlu1 %306  ;;  %v5473_v49 = vld [vmem:[#allocation2 + $0x180] sm:$0xff]  ;;  %v497_v3 = vld [vmem:[#allocation2 + $0x188] sm:$0x1]  ;;  %v5483_v2 = vsel %vm852_vm3, %v880_v31, %v881_v29 }
  0x94   :  { %373 = vst.msk [vmem:[#allocation2 + $0x201] sm:$0xff] %vm172_vm0, %v307_v5  ;;  %4201 = vmatprep.mubr.msk.bf16.mxu0 %vm172_vm0, %v556_v26  ;;  %v886_v23 = vrot.slane %v5473_v49, 1  ;;  %v887_v16 = vrot.slane %v497_v3, 1  ;;  %6450 = vst [vmem:[#allocation26_spill] sm:$0xff] %v5483_v2 }
  0x95   :  { %v5477_v17 = vld [vmem:[#allocation2 + $0x160] sm:$0xff]  ;;  %v493_v32 = vld [vmem:[#allocation2 + $0x168] sm:$0x1] }
  0x96   :  { %v303_v14 = vpop.permute.xlu0 %302  ;;  %v883_v4 = vrot.slane %v5477_v17, 1  ;;  %v884_v63 = vrot.slane %v493_v32, 1  ;;  %v557_v26 = vpack.c.bf16 %v5473_v49, %v5477_v17  ;;  %v5499_v29 = vsel %vm852_vm3, %v886_v23, %v887_v16 }
  0x97   :  { %371 = vst.msk [vmem:[#allocation2 + $0x1e1] sm:$0xff] %vm172_vm0, %v303_v14  ;;  %v253_v42 = vpop.permute.xlu1 %252  ;;  %v5489_v33 = vld [vmem:[#allocation2 + $0x1c0] sm:$0xff]  ;;  %v505_v14 = vld [vmem:[#allocation2 + $0x1c8] sm:$0x1]  ;;  %6452 = vst [vmem:[#allocation28_spill] sm:$0xff] %v5499_v29  ;;  %v854_v16 = vrot.slane %v451_v56, 1 }
  0x98   :  { %v5492_v3 = vsel %vm852_vm3, %v883_v4, %v884_v63  ;;  %346 = vst.msk [vmem:[#allocation2 + $0x31] sm:$0xff] %vm172_vm0, %v253_v42  ;;  %v892_v32 = vrot.slane %v5489_v33, 1  ;;  %v893_v25 = vrot.slane %v505_v14, 1 }
  0x99   :  { %6451 = vst [vmem:[#allocation27_spill] sm:$0xff] %v5492_v3  ;;  %v855_v51 = vsel %vm852_vm3, %v853_v13, %v854_v16 }
  0x9a   :  { %v249_v0 = vpop.permute.xlu0 %248  ;;  %v5495_v31 = vld [vmem:[#allocation2 + $0x1a0] sm:$0xff]  ;;  %v501_v5 = vld [vmem:[#allocation2 + $0x1a8] sm:$0x1] }
  0x9b   :  { %344 = vst.msk [vmem:[#allocation2 + $0x11] sm:$0xff] %vm172_vm0, %v249_v0  ;;  %v558_v63 = vpack.c.bf16 %v5489_v33, %v5495_v31  ;;  %v889_v42 = vrot.slane %v5495_v31, 1  ;;  %v890_v4 = vrot.slane %v501_v5, 1  ;;  %4202 = vmatmul.mubr.msk.bf16.gmra.mrb[8].mxu0 %vm172_vm0, %v557_v26  ;;  %v261_v23 = vpop.permute.xlu1 %260  ;;  %v5518_v5 = vld [vmem:[#allocation2 + $0x200] sm:$0xff]  ;;  %v5525_v26 = vsel %vm852_vm3, %v892_v32, %v893_v25 }
  0x9c   :  { %350 = vst.msk [vmem:[#allocation2 + $0x71] sm:$0xff] %vm172_vm0, %v261_v23  ;;  %6454 = vst [vmem:[#allocation30_spill] sm:$0xff] %v5525_v26 }
  0x9d   :  { %v5512_v14 = vsel %vm852_vm3, %v889_v42, %v890_v4  ;;  %4205 = vmatprep.mubr.msk.bf16.mxu0 %vm172_vm0, %v558_v63 }
  0x9e   :  { %6453 = vst [vmem:[#allocation29_spill] sm:$0xff] %v5512_v14  ;;  %v257_v0 = vpop.permute.xlu0 %256  ;;  %v5516_v47 = vld [vmem:[#allocation2 + $0x1e0] sm:$0xff]  ;;  %v509_v1 = vld [vmem:[#allocation2 + $0x1e8] sm:$0x1] }
  0x9f   :  { %348 = vst.msk [vmem:[#allocation2 + $0x51] sm:$0xff] %vm172_vm0, %v257_v0  ;;  %v895_v56 = vrot.slane %v5516_v47, 1  ;;  %v896_v42 = vrot.slane %v509_v1, 1  ;;  %v269_v63 = vpop.permute.xlu1 %268  ;;  %v559_v23 = vpack.c.bf16 %v5518_v5, %v5516_v47  ;;  %v917_v1 = vpack.c.bf16 %v5429_v7, %v855_v51 }
  0xa0   :  { %354 = vst.msk [vmem:[#allocation2 + $0xb1] sm:$0xff] %vm172_vm0, %v269_v63  ;;  %v485_v63 = vld [vmem:[#allocation2 + $0x128] sm:$0x1]  ;;  %v918_v51 = vpack.c.bf16 %v5409_v41, %v5432_v8 }
  0xa1   :  { %v5533_v48 = vsel %vm852_vm3, %v895_v56, %v896_v42  ;;  %v479_v56 = vld [vmem:[#allocation2 + $0xe8] sm:$0x1]  ;;  %v878_v25 = vrot.slane %v485_v63, 1 }
  0xa2   :  { %6455 = vst [vmem:[#allocation31_spill] sm:$0xff] %v5533_v48  ;;  %v265_v0 = vpop.permute.xlu0 %264 }
  0xa3   :  { %352 = vst.msk [vmem:[#allocation2 + $0x91] sm:$0xff] %vm172_vm0, %v265_v0  ;;  %4206 = vmatmul.mubr.msk.bf16.gmra.mrb[12].mxu0 %vm172_vm0, %v559_v23  ;;  %v277_v32 = vpop.permute.xlu1 %276  ;;  %v1102_v23 = vsel %vm595_vm2, %v5420_v34, 0  ;;  %v874_v0 = vrot.slane %v5462_v40, 1 }
  0xa4   :  { %358 = vst.msk [vmem:[#allocation2 + $0xf1] sm:$0xff] %vm172_vm0, %v277_v32  ;;  %4211 = vmatprep.mubr.msk.bf16.mxu0 %vm172_vm0, %v917_v1  ;;  %v919_v1 = vpack.c.bf16 %v5459_v60, %v5423_v43  ;;  %v875_v32 = vrot.slane %v479_v56, 1  ;;  %v453_v60 = vld [vmem:[#allocation2 + $0x18] sm:$0x1] }
  0xa6   :  { %v273_v13 = vpop.permute.xlu0 %272  ;;  %v5563_v56 = vsel %vm852_vm3, %v874_v0, %v875_v32 }
  0xa7   :  { %356 = vst.msk [vmem:[#allocation2 + $0xd1] sm:$0xff] %vm172_vm0, %v273_v13  ;;  %v285_v16 = vpop.permute.xlu1 %284  ;;  %v3867_v13 = vld [vmem:[%s6389_s3 + $0x8] sm:$0x3]  ;;  %6456 = vst [vmem:[#allocation32_spill] sm:$0xff] %v5563_v56  ;;  %v920_v63 = vpack.c.bf16 %v5563_v56, %v5453_v44  ;;  %v473_v43 = vld [vmem:[#allocation2 + $0xb8] sm:$0x1] }
  0xa8   :  { %362 = vst.msk [vmem:[#allocation2 + $0x151] sm:$0xff] %vm172_vm0, %v285_v16  ;;  %v877_v16 = vrot.slane %v5446_v21, 1 }
  0xaa   :  { %v281_v42 = vpop.permute.xlu0 %280  ;;  %v879_v21 = vsel %vm852_vm3, %v877_v16, %v878_v25  ;;  %v922_v16 = vpack.c.bf16 %v5499_v29, %v5492_v3  ;;  %v527_v29 = vld [vmem:[#allocation3 + $0x90] sm:$0xff]  ;;  %v3885_v3 = vld [vmem:[%s6389_s3 + $0xc] sm:$0x3] }
  0xab   :  { %360 = vst.msk [vmem:[#allocation2 + $0x131] sm:$0xff] %vm172_vm0, %v281_v42  ;;  %4212 = vmatmul.mubr.msk.bf16.vlgmr.msra.gmra.mrb[0].mxu0 %vm172_vm0, %v918_v51  ;;  %v293_v42 = vpop.permute.xlu1 %292  ;;  %v5617_v4 = vld [vmem:[#allocation2 + $0xf0] sm:$0xff] }
  0xac   :  { %4228 = vmatpush3.bf16.msra.mxu0 %v1102_v23  ;;  %366 = vst.msk [vmem:[#allocation2 + $0x191] sm:$0xff] %vm172_vm0, %v293_v42  ;;  %4215 = vmatprep.mubr.msk.bf16.mxu0 %vm172_vm0, %v919_v1  ;;  %v921_v23 = vpack.c.bf16 %v5483_v2, %v879_v21  ;;  %v898_v42 = vrot.slane %v5518_v5, 1 }
  0xad   :  { %4793 = vmatprep.subr.msk.bf16.mxu0 %vm595_vm2, %v3867_v13 }
  0xae   :  { %v289_v34 = vpop.permute.xlu0 %288 }
  0xaf   :  { %364 = vst.msk [vmem:[#allocation2 + $0x171] sm:$0xff] %vm172_vm0, %v289_v34  ;;  %v301_v61 = vpop.permute.xlu1 %300  ;;  %v923_v34 = vpack.c.bf16 %v5525_v26, %v5512_v14  ;;  %v5621_v45 = vld [vmem:[#allocation2 + $0x150] sm:$0xff] }
  0xb0   :  { %370 = vst.msk [vmem:[#allocation2 + $0x1d1] sm:$0xff] %vm172_vm0, %v301_v61  ;;  %v513_v61 = vld [vmem:[#allocation2 + $0x208] sm:$0x1]  ;;  %v523_v26 = vld [vmem:[#allocation3 + $0x50] sm:$0xff] }
  0xb1   :  { %v899_v21 = vrot.slane %v513_v61, 1  ;;  %v5599_v61 = vld [vmem:[#allocation2 + $0x70] sm:$0xff] }
  0xb2   :  { %v297_v51 = vpop.permute.xlu0 %296  ;;  %v5619_v54 = vld [vmem:[#allocation2 + $0x130] sm:$0xff] }
  0xb3   :  { %368 = vst.msk [vmem:[#allocation2 + $0x1b1] sm:$0xff] %vm172_vm0, %v297_v51  ;;  %4216 = vmatmul.mubr.msk.bf16.gmra.mrb[4].mxu0 %vm172_vm0, %v920_v63  ;;  %v309_v1 = vpop.permute.xlu1 %308  ;;  %v5584_v51 = vld [vmem:[#allocation2 + $0x10] sm:$0xff]  ;;  %v1071_v46 = vpack.c.bf16 %v5621_v45, %v5619_v54 }
  0xb4   :  { %374 = vst.msk [vmem:[#allocation2 + $0x211] sm:$0xff] %vm172_vm0, %v309_v1  ;;  %4219 = vmatprep.mubr.msk.bf16.mxu0 %vm172_vm0, %v921_v23  ;;  %v5586_v63 = vld [vmem:[#allocation2 + $0x30] sm:$0xff]  ;;  %v5589_v23 = vsel %vm852_vm3, %v898_v42, %v899_v21  ;;  %v1252_v21 = vsel %vm595_vm2, %v3867_v13, 0  ;;  %v1399_v44 = vrot.slane %v5584_v51, 1 }
  0xb5   :  { %6457 = vst [vmem:[#allocation33_spill] sm:$0xff] %v5589_v23  ;;  %v1067_v1 = vpack.c.bf16 %v5586_v63, %v5584_v51  ;;  %v1402_v41 = vrot.slane %v5586_v63, 1  ;;  %v1408_v51 = vrot.slane %v5599_v61, 1 }
  0xb6   :  { %v305_v0 = vpop.permute.xlu0 %304 }
  0xb7   :  { %372 = vst.msk [vmem:[#allocation2 + $0x1f1] sm:$0xff] %vm172_vm0, %v305_v0  ;;  %v311_v25 = vpop.permute.xlu1 %310  ;;  %v924_v0 = vpack.c.bf16 %v5589_v23, %v5533_v48  ;;  %v5636_v36 = vld [vmem:[#allocation2 + $0x1d0] sm:$0xff]  ;;  %v1217_v23 = vpack.c.bf16 %v521_v12, %v519_v38 }
  0xb8   :  { %375 = vst.msk [vmem:[#allocation2 + $0x221] sm:$0xff] %vm172_vm0, %v311_v25  ;;  %v5597_v25 = vld [vmem:[#allocation2 + $0x50] sm:$0xff] }
  0xb9   :  { %v1068_v42 = vpack.c.bf16 %v5599_v61, %v5597_v25  ;;  %v525_v48 = vld [vmem:[#allocation3 + $0x70] sm:$0xff]  ;;  %v1405_v63 = vrot.slane %v5597_v25, 1 }
  0xba   :  { %v279_v32 = vpop.permute.xlu0 %278  ;;  %v1218_v14 = vpack.c.bf16 %v525_v48, %v523_v26  ;;  %v531_v12 = vld [vmem:[#allocation3 + $0xd0] sm:$0xff] }
  0xbb   :  { %359 = vst.msk [vmem:[#allocation2 + $0x101] sm:$0xff] %vm172_vm0, %v279_v32  ;;  %4220 = vmatmul.mubr.msk.bf16.gmra.mrb[8].mxu0 %vm172_vm0, %v922_v16  ;;  %v5601_v32 = vld [vmem:[#allocation2 + $0x90] sm:$0xff] }
  0xbc   :  { %4223 = vmatprep.mubr.msk.bf16.mxu0 %vm172_vm0, %v923_v34  ;;  %v5603_v16 = vld [vmem:[#allocation2 + $0xb0] sm:$0xff] }
  0xbd   :  { %v1069_v34 = vpack.c.bf16 %v5603_v16, %v5601_v32  ;;  %v536_v38 = vld [vmem:[#allocation3 + $0x130] sm:$0xff]  ;;  %v1414_v7 = vrot.slane %v5603_v16, 1  ;;  %v1420_v16 = vrot.slane %v5617_v4, 1 }
  0xbe   :  { %v542_v26 = vld [vmem:[#allocation3 + $0x190] sm:$0xff] }
  0xc3   :  { %4224 = vmatmul.mubr.msk.bf16.gmra.mrb[12].mxu0 %vm172_vm0, %v924_v0  ;;  %v5615_v0 = vld [vmem:[#allocation2 + $0xd0] sm:$0xff] }
  0xc4   :  { %4229 = vmatprep.mubr.msk.bf16.mxu0 %vm172_vm0, %v1067_v1  ;;  %v3876_v1 = vld [vmem:[%s6389_s3 + $0xa] sm:$0x3]  ;;  %v1070_v13 = vpack.c.bf16 %v5617_v4, %v5615_v0 }
  0xc5   :  { %v1498_v2 = vsel %vm595_vm2, %v3876_v1, 0 }
  0xcb   :  { %4230 = vmatmul.mubr.msk.bf16.vlgmr.msra.gmra.mrb[0].mxu0 %vm172_vm0, %v1068_v42  ;;  %v5630_v42 = vld [vmem:[#allocation2 + $0x170] sm:$0xff] }
  0xcc   :  { %4246 = vmatpush3.bf16.msra.mxu0 %v1252_v21  ;;  %4233 = vmatprep.mubr.msk.bf16.mxu0 %vm172_vm0, %v1069_v34  ;;  %v5632_v34 = vld [vmem:[#allocation2 + $0x190] sm:$0xff] }
  0xcd   :  { %4794 = vmatprep.subr.msk.bf16.mxu0 %vm595_vm2, %v3876_v1  ;;  %v5634_v21 = vld [vmem:[#allocation2 + $0x1b0] sm:$0xff]  ;;  %v1072_v30 = vpack.c.bf16 %v5632_v34, %v5630_v42 }
  0xce   :  { %v1073_v37 = vpack.c.bf16 %v5636_v36, %v5634_v21  ;;  %v544_v1 = vld [vmem:[#allocation3 + $0x1b0] sm:$0xff] }
  0xd3   :  { %4234 = vmatmul.mubr.msk.bf16.gmra.mrb[4].mxu0 %vm172_vm0, %v1070_v13  ;;  %v5644_v13 = vld [vmem:[#allocation2 + $0x1f0] sm:$0xff] }
  0xd4   :  { %4237 = vmatprep.mubr.msk.bf16.mxu0 %vm172_vm0, %v1071_v46  ;;  %v5646_v46 = vld [vmem:[#allocation2 + $0x210] sm:$0xff] }
  0xd5   :  { %v1074_v15 = vpack.c.bf16 %v5646_v46, %v5644_v13 }
  0xdb   :  { %4238 = vmatmul.mubr.msk.bf16.gmra.mrb[8].mxu0 %vm172_vm0, %v1072_v30  ;;  %v529_v30 = vld [vmem:[#allocation3 + $0xb0] sm:$0xff] }
  0xdc   :  { %4241 = vmatprep.mubr.msk.bf16.mxu0 %vm172_vm0, %v1073_v37  ;;  %v1219_v37 = vpack.c.bf16 %v529_v30, %v527_v29  ;;  %v540_v29 = vld [vmem:[#allocation3 + $0x170] sm:$0xff] }
  0xdd   :  { %v546_v30 = vld [vmem:[#allocation3 + $0x1d0] sm:$0xff] }
  0xe3   :  { %4242 = vmatmul.mubr.msk.bf16.gmra.mrb[12].mxu0 %vm172_vm0, %v1074_v15  ;;  %v533_v15 = vld [vmem:[#allocation3 + $0xf0] sm:$0xff] }
  0xe4   :  { %4247 = vmatprep.mubr.msk.bf16.mxu0 %vm172_vm0, %v1217_v23  ;;  %v538_v23 = vld [vmem:[#allocation3 + $0x150] sm:$0xff]  ;;  %v1220_v56 = vpack.c.bf16 %v533_v15, %v531_v12  ;;  %v1400_v12 = vrot.slane %v453_v60, 1 }
  0xe5   :  { %v1221_v48 = vpack.c.bf16 %v538_v23, %v536_v38  ;;  %v550_v38 = vld [vmem:[#allocation3 + $0x210] sm:$0xff] }
  0xeb   :  { %4248 = vmatmul.mubr.msk.bf16.vlgmr.msra.gmra.mrb[0].mxu0 %vm172_vm0, %v1218_v14  ;;  %v1222_v14 = vpack.c.bf16 %v542_v26, %v540_v29  ;;  %v461_v26 = vld [vmem:[#allocation2 + $0x58] sm:$0x1] }
  0xec   :  { %4264 = vmatpush3.bf16.msra.mxu0 %v1498_v2  ;;  %4251 = vmatprep.mubr.msk.bf16.mxu0 %vm172_vm0, %v1219_v37  ;;  %v1223_v2 = vpack.c.bf16 %v546_v30, %v544_v1  ;;  %v457_v37 = vld [vmem:[#allocation2 + $0x38] sm:$0x1]  ;;  %v1406_v60 = vrot.slane %v461_v26, 1 }
  0xed   :  { %4795 = vmatprep.subr.msk.bf16.mxu0 %vm595_vm2, %v3885_v3  ;;  %v1403_v15 = vrot.slane %v457_v37, 1  ;;  %v465_v1 = vld [vmem:[#allocation2 + $0x78] sm:$0x1] }
  0xee   :  { %v469_v30 = vld [vmem:[#allocation2 + $0x98] sm:$0x1]  ;;  %v1409_v37 = vrot.slane %v465_v1, 1 }
  0xef   :  { %v1404_v29 = vsel %vm852_vm3, %v1402_v41, %v1403_v15  ;;  %v1407_v41 = vsel %vm852_vm3, %v1405_v63, %v1406_v60  ;;  %v1426_v63 = vrot.slane %v5621_v45, 1  ;;  %v503_v45 = vld [vmem:[#allocation2 + $0x1b8] sm:$0x1] }
  0xf0   :  { %v1410_v15 = vsel %vm852_vm3, %v1408_v51, %v1409_v37  ;;  %v3894_v51 = vld [vmem:[%s6389_s3 + $0xe] sm:$0x3] }
  0xf3   :  { %4252 = vmatmul.mubr.msk.bf16.gmra.mrb[4].mxu0 %vm172_vm0, %v1220_v56  ;;  %v548_v56 = vld [vmem:[#allocation3 + $0x1f0] sm:$0xff] }
  0xf4   :  { %4255 = vmatprep.mubr.msk.bf16.mxu0 %vm172_vm0, %v1221_v48  ;;  %v1224_v23 = vpack.c.bf16 %v550_v38, %v548_v56  ;;  %v1401_v48 = vsel %vm852_vm3, %v1399_v44, %v1400_v12  ;;  %v1412_v44 = vrot.slane %v469_v30, 1  ;;  %v1415_v12 = vrot.slane %v473_v43, 1  ;;  %v477_v56 = vld [vmem:[#allocation2 + $0xd8] sm:$0x1] }
  0xf5   :  { %v481_v38 = vld [vmem:[#allocation2 + $0xf8] sm:$0x1]  ;;  %v1417_v43 = vrot.slane %v5615_v0, 1  ;;  %v1418_v1 = vrot.slane %v477_v56, 1 }
  0xf6   :  { %v1416_v25 = vsel %vm852_vm3, %v1414_v7, %v1415_v12  ;;  %v1421_v30 = vrot.slane %v481_v38, 1  ;;  %v1423_v7 = vrot.slane %v5619_v54, 1  ;;  %v495_v54 = vld [vmem:[#allocation2 + $0x178] sm:$0x1]  ;;  %v1432_v12 = vrot.slane %v5632_v34, 1 }
  0xf7   :  { %v1435_v38 = vrot.slane %v5634_v21, 1  ;;  %v1444_v21 = vrot.slane %v5646_v46, 1  ;;  %v6458_v46 = vpack.c.bf16 %v5403_v52, %v5390_v9  ;;  %v482_v9 = vld [vmem:[#allocation2 + $0x100] sm:$0xff] }
  0xf8   :  { %v1422_v0 = vsel %vm852_vm3, %v1420_v16, %v1421_v30  ;;  %v1616_v52 = vpack.c.bf16 %v482_v9, %v5462_v40 }
  0xfb   :  { %4256 = vmatmul.mubr.msk.bf16.gmra.mrb[8].mxu0 %vm172_vm0, %v1222_v14  ;;  %v1463_v14 = vpack.c.bf16 %v1404_v29, %v1401_v48  ;;  %v487_v48 = vld [vmem:[#allocation2 + $0x138] sm:$0x1]  ;;  %v1464_v29 = vpack.c.bf16 %v1410_v15, %v1407_v41  ;;  %v1429_v15 = vrot.slane %v5630_v42, 1 }
  0xfc   :  { %4259 = vmatprep.mubr.msk.bf16.mxu0 %vm172_vm0, %v1223_v2  ;;  %v1411_v2 = vrot.slane %v5601_v32, 1  ;;  %v491_v32 = vld [vmem:[#allocation2 + $0x158] sm:$0x1] }
  0xfd   :  { %v1427_v4 = vrot.slane %v491_v32, 1  ;;  %v1436_v32 = vrot.slane %v503_v45, 1 }
  0xfe   :  { %v1413_v61 = vsel %vm852_vm3, %v1411_v2, %v1412_v44  ;;  %v499_v2 = vld [vmem:[#allocation2 + $0x198] sm:$0x1] }
  0xff   :  { %v1465_v26 = vpack.c.bf16 %v1416_v25, %v1413_v61  ;;  %v1428_v37 = vsel %vm852_vm3, %v1426_v63, %v1427_v4  ;;  %v507_v44 = vld [vmem:[#allocation2 + $0x1d8] sm:$0x1]  ;;  %v1430_v25 = vrot.slane %v495_v54, 1  ;;  %v1433_v56 = vrot.slane %v499_v2, 1 }
 0x100   :  { %v1439_v16 = vrot.slane %v507_v44, 1  ;;  %v6474_v2 = vld [vmem:[#allocation32_spill] sm:$0xff]  ;;  %v6476_v44 = vld [vmem:[#allocation26_spill] sm:$0xff] }
 0x101   :  { %v1434_v34 = vsel %vm852_vm3, %v1432_v12, %v1433_v56  ;;  %v6479_v56 = vld [vmem:[#allocation28_spill] sm:$0xff] }
 0x103   :  { %4260 = vmatmul.mubr.msk.bf16.gmra.mrb[12].mxu0 %vm172_vm0, %v1224_v23  ;;  %v1648_v23 = vsel %vm595_vm2, %v3885_v3, 0  ;;  %v1419_v3 = vsel %vm852_vm3, %v1417_v43, %v1418_v1  ;;  %v511_v43 = vld [vmem:[#allocation2 + $0x1f8] sm:$0x1] }
 0x104   :  { %4265 = vmatprep.mubr.msk.bf16.mxu0 %vm172_vm0, %v1463_v14  ;;  %v1424_v14 = vrot.slane %v487_v48, 1  ;;  %v1466_v41 = vpack.c.bf16 %v1422_v0, %v1419_v3  ;;  %v1438_v48 = vrot.slane %v5636_v36, 1  ;;  %v1441_v36 = vrot.slane %v5644_v13, 1  ;;  %v3903_v0 = vld [vmem:[%s6389_s3 + $0x10] sm:$0x3] }
 0x105   :  { %v1798_v13 = vsel %vm595_vm2, %v3894_v51, 0 }
 0x106   :  { %v1425_v60 = vsel %vm852_vm3, %v1423_v7, %v1424_v14  ;;  %v1440_v42 = vsel %vm852_vm3, %v1438_v48, %v1439_v16  ;;  %v1442_v7 = vrot.slane %v511_v43, 1  ;;  %v6481_v48 = vld [vmem:[#allocation31_spill] sm:$0xff]  ;;  %v3914_v43 = vld [vmem:[%s6390_s6 + $0x4] sm:$0xf] }
 0x107   :  { %v1467_v61 = vpack.c.bf16 %v1428_v37, %v1425_v60  ;;  %v6459_v60 = vpack.c.bf16 %v5400_v28, %v5387_v6  ;;  %v6460_v37 = vpack.c.bf16 %v5426_v62, %v5437_v57  ;;  %v6462_v6 = vpack.c.bf16 %v5495_v31, %v5473_v49  ;;  %v516_v62 = vld [vmem:[#allocation2 + $0x220] sm:$0xff]  ;;  %4799 = vmatprep.subr.msk.bf16.mxu1 %vm2273_vm7, %v3914_v43 }
 0x108   :  { %v1443_v14 = vsel %vm852_vm3, %v1441_v36, %v1442_v7  ;;  %v6463_v28 = vpack.c.bf16 %v5516_v47, %v5489_v33  ;;  %v1620_v40 = vpack.c.bf16 %v516_v62, %v5518_v5  ;;  %v6464_v57 = vpack.c.bf16 %v5234_v19, %v5232_v18  ;;  %v534_v33 = vld [vmem:[#allocation3 + $0x100] sm:$0xff] }
 0x109   :  { %v1960_v49 = vsel %vm595_vm2, %v3903_v0, 0  ;;  %v6465_v47 = vpack.c.bf16 %v5251_v22, %v5236_v20  ;;  %v1767_v18 = vpack.c.bf16 %v5330_v58, %v5314_v39  ;;  %v1768_v19 = vpack.c.bf16 %v5336_v59, %v5332_v10  ;;  %v551_v22 = vld [vmem:[#allocation3 + $0x220] sm:$0xff]  ;;  %v483_v39 = vld [vmem:[#allocation2 + $0x108] sm:$0x1] }
 0x10a   :  { %v1769_v20 = vpack.c.bf16 %v5352_v50, %v5338_v11  ;;  %v1917_v58 = vrot.slane %v482_v9, 1  ;;  %v1918_v10 = vrot.slane %v483_v39, 1  ;;  %v6468_v59 = vld [vmem:[#allocation22_spill] sm:$0xff]  ;;  %v6469_v31 = vld [vmem:[#allocation21_spill] sm:$0xff]  ;;  %v6471_v50 = vld [vmem:[#allocation24_spill] sm:$0xff] }
 0x10b   :  { %4266 = vmatmul.mubr.msk.bf16.vlgmr.msra.gmra.mrb[0].mxu0 %vm172_vm0, %v1464_v29  ;;  %v1431_v29 = vsel %vm852_vm3, %v1429_v15, %v1430_v25  ;;  %v6470_v11 = vpack.c.bf16 %v6468_v59, %v6469_v31  ;;  %v6472_v5 = vld [vmem:[#allocation25_spill] sm:$0xff]  ;;  %v1920_v15 = vrot.slane %v516_v62, 1 }
 0x10c   :  { %4282 = vmatpush3.bf16.msra.mxu0 %v1648_v23  ;;  %4269 = vmatprep.mubr.msk.bf16.mxu0 %vm172_vm0, %v1465_v26  ;;  %v1437_v23 = vsel %vm852_vm3, %v1435_v38, %v1436_v32  ;;  %v515_v26 = vld [vmem:[#allocation2 + $0x218] sm:$0x1]  ;;  %v1468_v1 = vpack.c.bf16 %v1434_v34, %v1431_v29  ;;  %v6473_v54 = vpack.c.bf16 %v6471_v50, %v6472_v5  ;;  %v6478_v25 = vld [vmem:[#allocation29_spill] sm:$0xff]  ;;  %v6482_v32 = vld [vmem:[#allocation30_spill] sm:$0xff] }
 0x10d   :  { %4796 = vmatprep.subr.msk.bf16.mxu0 %vm595_vm2, %v3894_v51  ;;  %v1469_v30 = vpack.c.bf16 %v1440_v42, %v1437_v23  ;;  %v1445_v63 = vrot.slane %v515_v26, 1  ;;  %v6461_v51 = vpack.c.bf16 %v5477_v17, %v5456_v55  ;;  %v1765_v55 = vpack.c.bf16 %v5307_v35, %v5256_v24  ;;  %v6466_v35 = vld [vmem:[#allocation23_spill] sm:$0xff]  ;;  %v6484_v34 = vld [vmem:[#allocation33_spill] sm:$0xff] }
 0x10e   :  { %v1766_v17 = vpack.c.bf16 %v534_v33, %v5309_v53  ;;  %v1770_v24 = vpack.c.bf16 %v551_v22, %v5354_v27  ;;  %v6467_v53 = vpack.c.bf16 %v5432_v8, %v6466_v35  ;;  %v1919_v27 = vsel %vm852_vm3, %v1917_v58, %v1918_v10  ;;  %v6475_v8 = vld [vmem:[#allocation27_spill] sm:$0xff] }
 0x10f   :  { %v1446_v4 = vsel %vm852_vm3, %v1444_v21, %v1445_v63  ;;  %v1928_v45 = vpack.c.bf16 %v1919_v27, %v6474_v2  ;;  %v6477_v12 = vpack.c.bf16 %v6475_v8, %v6476_v44  ;;  %v6480_v38 = vpack.c.bf16 %v6478_v25, %v6479_v56  ;;  %v5886_v21 = vld [vmem:[%s6390_s6] sm:$0xf] }
 0x110   :  { %v1470_v3 = vpack.c.bf16 %v1446_v4, %v1443_v14  ;;  %v6483_v16 = vpack.c.bf16 %v6481_v48, %v6482_v32  ;;  %v6485_v42 = vmov 0.0   ;;  %v2275_v26 = vsel %vm2273_vm7, %v3914_v43, 0 }
 0x111   :  { %2076 = vst.msk [vmem:[#allocation4] sm:$0xff] %vm2075_vm4, %v6485_v42  ;;  %2079 = vst.msk [vmem:[#allocation4 + $0xa0] sm:$0xff] %vm2075_vm4, %v6485_v42  ;;  %4516 = vmatpush3.bf16.msra.mxu1 %v2275_v26 }
 0x112   :  { %2082 = vst.msk [vmem:[#allocation4 + $0x90] sm:$0xff] %vm2075_vm4, %v6485_v42  ;;  %2084 = vst.msk [vmem:[#allocation4 + $0x130] sm:$0xff] %vm2075_vm4, %v6485_v42  ;;  %4800 = vmatprep.subr.msk.bf16.mxu1 %vm2273_vm7, %v5886_v21 }
 0x113   :  { %4270 = vmatmul.mubr.msk.bf16.gmra.mrb[4].mxu0 %vm172_vm0, %v1466_v41  ;;  %v517_v41 = vld [vmem:[#allocation2 + $0x228] sm:$0x1]  ;;  %2088 = vst.msk [vmem:[#allocation4 + $0x10] sm:$0x1] %vm2087_vm5, %v6485_v42  ;;  %2089 = vst.msk [vmem:[#allocation4 + $0x20] sm:$0x1] %vm2087_vm5, %v6485_v42 }
 0x114   :  { %4273 = vmatprep.mubr.msk.bf16.mxu0 %vm172_vm0, %v1467_v61  ;;  %v1921_v61 = vrot.slane %v517_v41, 1  ;;  %2090 = vst.msk [vmem:[#allocation4 + $0x30] sm:$0x1] %vm2087_vm5, %v6485_v42  ;;  %2091 = vst.msk [vmem:[#allocation4 + $0x40] sm:$0x1] %vm2087_vm5, %v6485_v42 }
 0x115   :  { %2092 = vst.msk [vmem:[#allocation4 + $0x50] sm:$0x1] %vm2087_vm5, %v6485_v42  ;;  %2093 = vst.msk [vmem:[#allocation4 + $0x60] sm:$0x1] %vm2087_vm5, %v6485_v42 }
 0x116   :  { %v1922_v29 = vsel %vm852_vm3, %v1920_v15, %v1921_v61  ;;  %2094 = vst.msk [vmem:[#allocation4 + $0x70] sm:$0x1] %vm2087_vm5, %v6485_v42  ;;  %2095 = vst.msk [vmem:[#allocation4 + $0x80] sm:$0x1] %vm2087_vm5, %v6485_v42 }
 0x117   :  { %v1932_v23 = vpack.c.bf16 %v1922_v29, %v6484_v34  ;;  %2096 = vst.msk [vmem:[#allocation4 + $0xb0] sm:$0x1] %vm2087_vm5, %v6485_v42  ;;  %2097 = vst.msk [vmem:[#allocation4 + $0xc0] sm:$0x1] %vm2087_vm5, %v6485_v42 }
 0x118   :  { %2098 = vst.msk [vmem:[#allocation4 + $0xd0] sm:$0x1] %vm2087_vm5, %v6485_v42  ;;  %2099 = vst.msk [vmem:[#allocation4 + $0xe0] sm:$0x1] %vm2087_vm5, %v6485_v42 }
 0x119   :  { %2100 = vst.msk [vmem:[#allocation4 + $0xf0] sm:$0x1] %vm2087_vm5, %v6485_v42  ;;  %2101 = vst.msk [vmem:[#allocation4 + $0x100] sm:$0x1] %vm2087_vm5, %v6485_v42 }
 0x11a   :  { %2102 = vst.msk [vmem:[#allocation4 + $0x110] sm:$0x1] %vm2087_vm5, %v6485_v42  ;;  %2103 = vst.msk [vmem:[#allocation4 + $0x120] sm:$0x1] %vm2087_vm5, %v6485_v42 }
 0x11b   :  { %4274 = vmatmul.mubr.msk.bf16.gmra.mrb[8].mxu0 %vm172_vm0, %v1468_v1  ;;  %2104 = vst.msk [vmem:[#allocation4 + $0x19] sm:$0x1] %vm2087_vm5, %v6485_v42  ;;  %2105 = vst.msk [vmem:[#allocation4 + $0x29] sm:$0x1] %vm2087_vm5, %v6485_v42  ;;  %v5893_v1 = vld [vmem:[%s6391_s4] ss:$0 sm:$0xff] }
 0x11c   :  { %4277 = vmatprep.mubr.msk.bf16.mxu0 %vm172_vm0, %v1469_v30  ;;  %2106 = vst.msk [vmem:[#allocation4 + $0x39] sm:$0x1] %vm2087_vm5, %v6485_v42  ;;  %2107 = vst.msk [vmem:[#allocation4 + $0x49] sm:$0x1] %vm2087_vm5, %v6485_v42  ;;  %v5898_v30 = vld [vmem:[%s6392_s5] ss:$0 sm:$0xff] }
 0x11d   :  { %2108 = vst.msk [vmem:[#allocation4 + $0x59] sm:$0x1] %vm2087_vm5, %v6485_v42  ;;  %2109 = vst.msk [vmem:[#allocation4 + $0x69] sm:$0x1] %vm2087_vm5, %v6485_v42 }
 0x11e   :  { %2110 = vst.msk [vmem:[#allocation4 + $0x79] sm:$0x1] %vm2087_vm5, %v6485_v42  ;;  %2111 = vst.msk [vmem:[#allocation4 + $0x89] sm:$0x1] %vm2087_vm5, %v6485_v42 }
 0x11f   :  { %2112 = vst.msk [vmem:[#allocation4 + $0xb9] sm:$0x1] %vm2087_vm5, %v6485_v42  ;;  %2113 = vst.msk [vmem:[#allocation4 + $0xc9] sm:$0x1] %vm2087_vm5, %v6485_v42 }
 0x120   :  { %2114 = vst.msk [vmem:[#allocation4 + $0xd9] sm:$0x1] %vm2087_vm5, %v6485_v42  ;;  %2115 = vst.msk [vmem:[#allocation4 + $0xe9] sm:$0x1] %vm2087_vm5, %v6485_v42 }
 0x121   :  { %2116 = vst.msk [vmem:[#allocation4 + $0xf9] sm:$0x1] %vm2087_vm5, %v6485_v42  ;;  %2117 = vst.msk [vmem:[#allocation4 + $0x109] sm:$0x1] %vm2087_vm5, %v6485_v42 }
 0x122   :  { %2118 = vst.msk [vmem:[#allocation4 + $0x119] sm:$0x1] %vm2087_vm5, %v6485_v42  ;;  %2119 = vst.msk [vmem:[#allocation4 + $0x129] sm:$0x1] %vm2087_vm5, %v6485_v42 }
 0x123   :  { %4278 = vmatmul.mubr.msk.bf16.gmra.mrb[12].mxu0 %vm172_vm0, %v1470_v3  ;;  %2078 = vst.msk [vmem:[#allocation4 + $0x8] sm:$0x3] %vm2077_vm6, %v6485_v42  ;;  %2080 = vst.msk [vmem:[#allocation4 + $0xa8] sm:$0x3] %vm2077_vm6, %v6485_v42 }
 0x124   :  { %4283 = vmatprep.mubr.msk.bf16.mxu0 %vm172_vm0, %v6458_v46  ;;  %2083 = vst.msk [vmem:[#allocation4 + $0x98] sm:$0x3] %vm2077_vm6, %v6485_v42  ;;  %2085 = vst.msk [vmem:[#allocation4 + $0x138] sm:$0x3] %vm2077_vm6, %v6485_v42 }
 0x12b   :  { %4284 = vmatmul.mubr.msk.bf16.vlgmr.msra.gmra.mrb[0].mxu0 %vm172_vm0, %v6459_v60 }
 0x12c   :  { %4300 = vmatpush3.bf16.msra.mxu0 %v1798_v13  ;;  %4287 = vmatprep.mubr.msk.bf16.mxu0 %vm172_vm0, %v6460_v37 }
 0x12d   :  { %4797 = vmatprep.subr.msk.bf16.mxu0 %vm595_vm2, %v3903_v0 }
 0x133   :  { %4288 = vmatmul.mubr.msk.bf16.gmra.mrb[4].mxu0 %vm172_vm0, %v1616_v52 }
 0x134   :  { %4291 = vmatprep.mubr.msk.bf16.mxu0 %vm172_vm0, %v6461_v51 }
 0x13b   :  { %4292 = vmatmul.mubr.msk.bf16.gmra.mrb[8].mxu0 %vm172_vm0, %v6462_v6 }
 0x13c   :  { %4295 = vmatprep.mubr.msk.bf16.mxu0 %vm172_vm0, %v6463_v28 }
 0x143   :  { %4296 = vmatmul.mubr.msk.bf16.gmra.mrb[12].mxu0 %vm172_vm0, %v1620_v40 }
 0x144   :  { %4301 = vmatprep.mubr.msk.bf16.mxu0 %vm172_vm0, %v6464_v57 }
 0x14b   :  { %4302 = vmatmul.mubr.msk.bf16.vlgmr.msra.gmra.mrb[0].mxu0 %vm172_vm0, %v6465_v47 }
 0x14c   :  { %4318 = vmatpush3.bf16.msra.mxu0 %v1960_v49  ;;  %4305 = vmatprep.mubr.msk.bf16.mxu0 %vm172_vm0, %v1765_v55 }
 0x14d   :  { %4798 = vmatprep.subr.msk.bf16.mxu0 %vm2273_vm7, %v3914_v43 }
 0x153   :  { %4306 = vmatmul.mubr.msk.bf16.gmra.mrb[4].mxu0 %vm172_vm0, %v1766_v17 }
 0x154   :  { %4309 = vmatprep.mubr.msk.bf16.mxu0 %vm172_vm0, %v1767_v18 }
 0x15b   :  { %4310 = vmatmul.mubr.msk.bf16.gmra.mrb[8].mxu0 %vm172_vm0, %v1768_v19 }
 0x15c   :  { %4313 = vmatprep.mubr.msk.bf16.mxu0 %vm172_vm0, %v1769_v20 }
 0x163   :  { %4314 = vmatmul.mubr.msk.bf16.gmra.mrb[12].mxu0 %vm172_vm0, %v1770_v24  ;;  %v2223_v24 = vld [vmem:[#allocation4 + $0x1] sm:$0xff] }
 0x164   :  { %4319 = vmatprep.mubr.msk.bf16.mxu0 %vm172_vm0, %v6467_v53 }
 0x16b   :  { %4320 = vmatmul.mubr.msk.bf16.vlgmr.msra.gmra.mrb[0].mxu0 %vm172_vm0, %v6470_v11 }
 0x16c   :  { %4323 = vmatprep.mubr.msk.bf16.mxu0 %vm172_vm0, %v6473_v54  ;;  %4336 = vmatpush3.bf16.msra.mxu0 %v2275_v26 }
 0x173   :  { %4324 = vmatmul.mubr.msk.bf16.gmra.mrb[4].mxu0 %vm172_vm0, %v1928_v45 }
 0x174   :  { %4327 = vmatprep.mubr.msk.bf16.mxu0 %vm172_vm0, %v6477_v12 }
 0x17b   :  { %4328 = vmatmul.mubr.msk.bf16.gmra.mrb[8].mxu0 %vm172_vm0, %v6480_v38 }
 0x17c   :  { %4331 = vmatprep.mubr.msk.bf16.mxu0 %vm172_vm0, %v6483_v16 }
 0x183   :  { %4332 = vmatmul.mubr.msk.bf16.gmra.mrb[12].mxu0 %vm172_vm0, %v1932_v23 }
 0x23e   :  { %v4321_v36 = vpop.f32.mrb[0].mxu0 }
 0x23f   :  { %v2129_v7 = vmul.f32 %v4321_v36, %v5893_v1  ;;  %v1996_v63 = vpop.f32.mrb[1].mxu0 }
 0x240   :  { %v2127_v14 = vmul.f32 %v5893_v1, %v1996_v63  ;;  %v4322_v4 = vpop.f32.mrb[2].mxu0 }
 0x241   :  { %v2152_v3 = vadd.f32 %v5898_v30, %v2129_v7  ;;  %v2130_v46 = vmul.f32 %v4322_v4, %v5893_v1  ;;  %v1999_v13 = vpop.f32.mrb[3].mxu0 }
 0x242   :  { %v2150_v0 = vadd.f32 %v5898_v30, %v2127_v14  ;;  %v2128_v60 = vmul.f32 %v5893_v1, %v1999_v13 }
 0x243   :  { %v2168_v37 = vmax.f32 %v2152_v3, 0.0  ;;  %v2153_v9 = vadd.f32 %v5898_v30, %v2130_v46 }
 0x244   :  { %v2166_v52 = vmax.f32 %v2150_v0, 0.0  ;;  %v2151_v51 = vadd.f32 %v5898_v30, %v2128_v60 }
 0x245   :  { %2184 = vst.msk [vmem:[#allocation4 + $0x31] sm:$0xff] %vm2075_vm4, %v2168_v37  ;;  %v2169_v6 = vmax.f32 %v2153_v9, 0.0 }
 0x246   :  { %2182 = vst.msk [vmem:[#allocation4 + $0x11] sm:$0xff] %vm2075_vm4, %v2166_v52  ;;  %v2167_v28 = vmax.f32 %v2151_v51, 0.0  ;;  %v4325_v62 = vpop.f32.mrb[4].mxu0 }
 0x247   :  { %2185 = vst.msk [vmem:[#allocation4 + $0x41] sm:$0xff] %vm2075_vm4, %v2169_v6  ;;  %v2133_v40 = vmul.f32 %v4325_v62, %v5893_v1  ;;  %v2012_v57 = vpop.f32.mrb[5].mxu0 }
 0x248   :  { %2183 = vst.msk [vmem:[#allocation4 + $0x21] sm:$0xff] %vm2075_vm4, %v2167_v28  ;;  %v2131_v55 = vmul.f32 %v5893_v1, %v2012_v57  ;;  %v4326_v49 = vpop.f32.mrb[6].mxu0 }
 0x249   :  { %v2156_v47 = vadd.f32 %v5898_v30, %v2133_v40  ;;  %v2134_v33 = vmul.f32 %v4326_v49, %v5893_v1  ;;  %v2015_v17 = vpop.f32.mrb[7].mxu0 }
 0x24a   :  { %v2154_v18 = vadd.f32 %v5898_v30, %v2131_v55  ;;  %v2132_v19 = vmul.f32 %v5893_v1, %v2015_v17  ;;  %v2231_v17 = vld [vmem:[#allocation4 + $0xa1] sm:$0xff] }
 0x24b   :  { %v2172_v20 = vmax.f32 %v2156_v47, 0.0  ;;  %v2157_v22 = vadd.f32 %v5898_v30, %v2134_v33 }
 0x24c   :  { %v2170_v35 = vmax.f32 %v2154_v18, 0.0  ;;  %v2155_v53 = vadd.f32 %v5898_v30, %v2132_v19  ;;  %v5923_v10 = vld [vmem:[#allocation4 + $0x31] sm:$0xff] }
 0x24d   :  { %2188 = vst.msk [vmem:[#allocation4 + $0x71] sm:$0xff] %vm2075_vm4, %v2172_v20  ;;  %v2173_v39 = vmax.f32 %v2157_v22, 0.0  ;;  %v5921_v58 = vld [vmem:[#allocation4 + $0x11] sm:$0xff] }
 0x24e   :  { %2186 = vst.msk [vmem:[#allocation4 + $0x51] sm:$0xff] %vm2075_vm4, %v2170_v35  ;;  %v2171_v59 = vmax.f32 %v2155_v53, 0.0  ;;  %v4329_v31 = vpop.f32.mrb[8].mxu0  ;;  %v2239_v11 = vpack.c.bf16 %v5921_v58, %v2223_v24  ;;  %v5927_v50 = vld [vmem:[#allocation4 + $0x41] sm:$0xff]  ;;  %v5929_v5 = vld [vmem:[#allocation4 + $0x32] sm:$0xff] }
 0x24f   :  { %v5931_v54 = vld [vmem:[#allocation4 + $0x42] sm:$0xff]  ;;  %2189 = vst.msk [vmem:[#allocation4 + $0x81] sm:$0xff] %vm2075_vm4, %v2173_v39  ;;  %v2137_v27 = vmul.f32 %v4329_v31, %v5893_v1  ;;  %v2028_v2 = vpop.f32.mrb[9].mxu0  ;;  %v5952_v48 = vld [vmem:[#allocation4 + $0x12] sm:$0xff] }
 0x250   :  { %v5935_v45 = vld [vmem:[#allocation4 + $0x21] sm:$0xff]  ;;  %2187 = vst.msk [vmem:[#allocation4 + $0x61] sm:$0xff] %vm2075_vm4, %v2171_v59  ;;  %v2135_v41 = vmul.f32 %v5893_v1, %v2028_v2  ;;  %v4330_v15 = vpop.f32.mrb[10].mxu0  ;;  %4337 = vmatprep.mubr.msk.bf16.mxu0 %vm2075_vm4, %v2239_v11 }
 0x251   :  { %v5937_v8 = vld [vmem:[#allocation4 + $0x22] sm:$0xff]  ;;  %v5948_v61 = vpack.c.bf16 %v5923_v10, %v5935_v45  ;;  %v2160_v25 = vadd.f32 %v5898_v30, %v2137_v27  ;;  %v2138_v56 = vmul.f32 %v4330_v15, %v5893_v1  ;;  %v2031_v38 = vpop.f32.mrb[11].mxu0 }
 0x252   :  { %v2158_v16 = vadd.f32 %v5898_v30, %v2135_v41  ;;  %v2136_v29 = vmul.f32 %v5893_v1, %v2031_v38  ;;  %v2399_v41 = vsel %vm2273_vm7, %v5886_v21, 0  ;;  %v6111_v49 = vpack.c.bf16 %v5929_v5, %v5937_v8 }
 0x253   :  { %4338 = vmatmul.mubr.msk.bf16.vlgmr.msra.gmra.mrb[16].mxu0 %vm2075_vm4, %v5948_v61  ;;  %v2176_v23 = vmax.f32 %v2160_v25, 0.0  ;;  %v2161_v42 = vadd.f32 %v5898_v30, %v2138_v56  ;;  %v3931_v25 = vld [vmem:[%s6390_s6 + $0x8] sm:$0xf] }
 0x254   :  { %v2174_v43 = vmax.f32 %v2158_v16, 0.0  ;;  %v2159_v26 = vadd.f32 %v5898_v30, %v2136_v29  ;;  %v5976_v0 = vld [vmem:[#allocation4 + $0x71] sm:$0xff]  ;;  %v2198_v29 = vld [vmem:[#allocation4] sm:$0xff] }
 0x255   :  { %2192 = vst.msk [vmem:[#allocation4 + $0xd1] sm:$0xff] %vm2075_vm4, %v2176_v23  ;;  %v2177_v36 = vmax.f32 %v2161_v42, 0.0  ;;  %v5965_v7 = vld [vmem:[#allocation4 + $0x51] sm:$0xff] }
 0x256   :  { %2190 = vst.msk [vmem:[#allocation4 + $0xb1] sm:$0xff] %vm2075_vm4, %v2174_v43  ;;  %v2175_v63 = vmax.f32 %v2159_v26, 0.0  ;;  %v4333_v14 = vpop.f32.mrb[12].mxu0  ;;  %v5970_v4 = vpack.c.bf16 %v5965_v7, %v5927_v50  ;;  %v5990_v62 = vld [vmem:[#allocation4 + $0x52] sm:$0xff] }
 0x257   :  { %2193 = vst.msk [vmem:[#allocation4 + $0xe1] sm:$0xff] %vm2075_vm4, %v2177_v36  ;;  %v2141_v3 = vmul.f32 %v4333_v14, %v5893_v1  ;;  %v2044_v46 = vpop.f32.mrb[13].mxu0  ;;  %v5974_v13 = vld [vmem:[#allocation4 + $0x61] sm:$0xff]  ;;  %v6050_v23 = vld [vmem:[#allocation4 + $0x10] sm:$0xff]  ;;  %v6116_v34 = vpack.c.bf16 %v5990_v62, %v5931_v54 }
 0x258   :  { %v5978_v60 = vld [vmem:[#allocation4 + $0x62] sm:$0xff]  ;;  %2191 = vst.msk [vmem:[#allocation4 + $0xc1] sm:$0xff] %vm2075_vm4, %v2175_v63  ;;  %v2139_v37 = vmul.f32 %v5893_v1, %v2044_v46  ;;  %v4334_v9 = vpop.f32.mrb[14].mxu0  ;;  %4341 = vmatprep.mubr.msk.bf16.mxu0 %vm2075_vm4, %v5970_v4  ;;  %v5986_v52 = vpack.c.bf16 %v5976_v0, %v5974_v13  ;;  %v2214_v14 = vpack.c.bf16 %v6050_v23, %v2198_v29 }
 0x259   :  { %v2164_v51 = vadd.f32 %v5898_v30, %v2141_v3  ;;  %v2142_v6 = vmul.f32 %v4334_v9, %v5893_v1  ;;  %v2047_v28 = vpop.f32.mrb[15].mxu0  ;;  %v6074_v9 = vld [vmem:[#allocation4 + $0x50] sm:$0xff]  ;;  %v2498_v46 = vld [vmem:[#allocation4 + $0x2] sm:$0xff] }
 0x25a   :  { %v2162_v57 = vadd.f32 %v5898_v30, %v2139_v37  ;;  %v2140_v55 = vmul.f32 %v5893_v1, %v2047_v28  ;;  %v2200_v37 = vld [vmem:[#allocation4 + $0x20] sm:$0xff]  ;;  %v2549_v28 = vsel %vm2273_vm7, %v3931_v25, 0  ;;  %v3949_v3 = vld [vmem:[%s6390_s6 + $0x10] sm:$0xf] }
 0x25b   :  { %4342 = vmatmul.mubr.msk.bf16.gmra.mrb[20].mxu0 %vm2075_vm4, %v5986_v52  ;;  %v2180_v47 = vmax.f32 %v2164_v51, 0.0  ;;  %v2165_v33 = vadd.f32 %v5898_v30, %v2142_v6  ;;  %v2201_v51 = vld [vmem:[#allocation4 + $0x30] sm:$0xff]  ;;  %v2881_v32 = vsel %vm2273_vm7, %v3949_v3, 0 }
 0x25c   :  { %v2178_v18 = vmax.f32 %v2162_v57, 0.0  ;;  %v2163_v19 = vadd.f32 %v5898_v30, %v2140_v55  ;;  %v6005_v24 = vld [vmem:[#allocation4 + $0xd1] sm:$0xff]  ;;  %v6076_v6 = vpack.c.bf16 %v2201_v51, %v2200_v37  ;;  %v2202_v57 = vld [vmem:[#allocation4 + $0x40] sm:$0xff] }
 0x25d   :  { %2196 = vst.msk [vmem:[#allocation4 + $0x111] sm:$0xff] %vm2075_vm4, %v2180_v47  ;;  %v2181_v20 = vmax.f32 %v2165_v33, 0.0  ;;  %v6003_v22 = vld [vmem:[#allocation4 + $0xb1] sm:$0xff]  ;;  %v6080_v55 = vpack.c.bf16 %v6074_v9, %v2202_v57  ;;  %v3940_v47 = vld [vmem:[%s6390_s6 + $0xc] sm:$0xf]  ;;  %v2204_v33 = vld [vmem:[#allocation4 + $0x60] sm:$0xff]  ;;  %v2681_v44 = vpack.c.bf16 %v2202_v57, %v2201_v51 }
 0x25e   :  { %2194 = vst.msk [vmem:[#allocation4 + $0xf1] sm:$0xff] %vm2075_vm4, %v2178_v18  ;;  %v2179_v1 = vmax.f32 %v2163_v19, 0.0  ;;  %v2243_v35 = vpack.c.bf16 %v6003_v22, %v2231_v17  ;;  %v6009_v53 = vld [vmem:[#allocation4 + $0xe1] sm:$0xff]  ;;  %v6011_v39 = vld [vmem:[#allocation4 + $0xd2] sm:$0xff]  ;;  %v2715_v12 = vsel %vm2273_vm7, %v3940_v47, 0 }
 0x25f   :  { %v6013_v59 = vld [vmem:[#allocation4 + $0xe2] sm:$0xff]  ;;  %2197 = vst.msk [vmem:[#allocation4 + $0x121] sm:$0xff] %vm2075_vm4, %v2181_v20  ;;  %v6032_v15 = vld [vmem:[#allocation4 + $0xb2] sm:$0xff] }
 0x260   :  { %v6016_v30 = vld [vmem:[#allocation4 + $0xc1] sm:$0xff]  ;;  %2195 = vst.msk [vmem:[#allocation4 + $0x101] sm:$0xff] %vm2075_vm4, %v2179_v1  ;;  %4345 = vmatprep.mubr.msk.bf16.mxu1 %vm2075_vm4, %v2243_v35  ;;  %v2207_v18 = vld [vmem:[#allocation4 + $0xb0] sm:$0xff] }
 0x261   :  { %v6018_v31 = vld [vmem:[#allocation4 + $0xc2] sm:$0xff]  ;;  %v6028_v2 = vpack.c.bf16 %v6005_v24, %v6016_v30  ;;  %v2205_v19 = vld [vmem:[#allocation4 + $0x70] sm:$0xff] }
 0x262   :  { %v2206_v17 = vld [vmem:[#allocation4 + $0xa0] sm:$0xff]  ;;  %v6090_v20 = vpack.c.bf16 %v2205_v19, %v2204_v33 }
 0x263   :  { %4346 = vmatmul.mubr.msk.bf16.vlgmr.msra.gmra.mrb[0].mxu1 %vm2075_vm4, %v6028_v2  ;;  %v2218_v1 = vpack.c.bf16 %v2207_v18, %v2206_v17  ;;  %v2208_v35 = vld [vmem:[#allocation4 + $0xc0] sm:$0xff] }
 0x264   :  { %4354 = vmatpush3.bf16.msra.mxu1 %v2399_v41  ;;  %v6054_v43 = vld [vmem:[#allocation4 + $0x111] sm:$0xff] }
 0x265   :  { %4801 = vmatprep.subr.msk.bf16.mxu1 %vm2273_vm7, %v3931_v25  ;;  %v6044_v16 = vld [vmem:[#allocation4 + $0xf1] sm:$0xff] }
 0x266   :  { %v6048_v21 = vpack.c.bf16 %v6044_v16, %v6009_v53  ;;  %v6064_v63 = vld [vmem:[#allocation4 + $0xf2] sm:$0xff]  ;;  %v2679_v51 = vld [vmem:[#allocation4 + $0x120] sm:$0xff] }
 0x267   :  { %v6052_v42 = vld [vmem:[#allocation4 + $0x101] sm:$0xff]  ;;  %v2211_v41 = vld [vmem:[#allocation4 + $0xf0] sm:$0xff]  ;;  %v6139_v56 = vpack.c.bf16 %v6064_v63, %v6013_v59 }
 0x268   :  { %v6056_v26 = vld [vmem:[#allocation4 + $0x102] sm:$0xff]  ;;  %4349 = vmatprep.mubr.msk.bf16.mxu1 %vm2075_vm4, %v6048_v21  ;;  %v6062_v36 = vpack.c.bf16 %v6054_v43, %v6052_v42  ;;  %v2209_v25 = vld [vmem:[#allocation4 + $0xd0] sm:$0xff] }
 0x269   :  { %v6095_v29 = vpack.c.bf16 %v2209_v25, %v2208_v35  ;;  %v2212_v17 = vld [vmem:[#allocation4 + $0x100] sm:$0xff]  ;;  %v2213_v27 = vld [vmem:[#allocation4 + $0x110] sm:$0xff]  ;;  %6487 = vst [vmem:[#allocation22_spill] sm:$0xff] %v6139_v56 }
 0x26a   :  { %v6103_v38 = vpack.c.bf16 %v2213_v27, %v2212_v17 }
 0x26b   :  { %4350 = vmatmul.mubr.msk.bf16.gmra.mrb[4].mxu1 %vm2075_vm4, %v6062_v36 }
 0x26c   :  { %4355 = vmatprep.mubr.msk.bf16.mxu1 %vm2075_vm4, %v2214_v14  ;;  %v2210_v14 = vld [vmem:[#allocation4 + $0xe0] sm:$0xff] }
 0x273   :  { %4356 = vmatmul.mubr.msk.bf16.vlgmr.msra.gmra.mrb[8].mxu1 %vm2075_vm4, %v6076_v6 }
 0x274   :  { %4372 = vmatpush3.bf16.msra.mxu1 %v2549_v28  ;;  %4359 = vmatprep.mubr.msk.bf16.mxu1 %vm2075_vm4, %v6080_v55  ;;  %v6097_v28 = vpack.c.bf16 %v2211_v41, %v2210_v14 }
 0x275   :  { %4802 = vmatprep.subr.msk.bf16.mxu1 %vm2273_vm7, %v3940_v47 }
 0x27b   :  { %4360 = vmatmul.mubr.msk.bf16.gmra.mrb[12].mxu1 %vm2075_vm4, %v6090_v20 }
 0x27c   :  { %4363 = vmatprep.mubr.msk.bf16.mxu1 %vm2075_vm4, %v2218_v1  ;;  %v2514_v1 = vpack.c.bf16 %v5952_v48, %v2498_v46  ;;  %v2506_v46 = vld [vmem:[#allocation4 + $0xa2] sm:$0xff] }
 0x27d   :  { %v2518_v11 = vpack.c.bf16 %v6032_v15, %v2506_v46  ;;  %v2513_v46 = vld [vmem:[#allocation4 + $0x112] sm:$0xff] }
 0x27e   :  { %v6146_v40 = vpack.c.bf16 %v2513_v46, %v6056_v26 }
 0x280   :  { %6488 = vst [vmem:[#allocation21_spill] sm:$0xff] %v6146_v40 }
 0x283   :  { %4364 = vmatmul.mubr.msk.bf16.gmra.mrb[0].mxu1 %vm2075_vm4, %v6095_v29 }
 0x284   :  { %4367 = vmatprep.mubr.msk.bf16.mxu1 %vm2075_vm4, %v6097_v28 }
 0x28b   :  { %4368 = vmatmul.mubr.msk.bf16.gmra.mrb[4].mxu1 %vm2075_vm4, %v6103_v38 }
 0x28c   :  { %4373 = vmatprep.mubr.msk.bf16.mxu1 %vm2075_vm4, %v2514_v1  ;;  %v2505_v1 = vld [vmem:[#allocation4 + $0x72] sm:$0xff] }
 0x28d   :  { %v6127_v47 = vpack.c.bf16 %v2505_v1, %v5978_v60 }
 0x28f   :  { %6486 = vst [vmem:[#allocation23_spill] sm:$0xff] %v6127_v47 }
 0x293   :  { %4374 = vmatmul.mubr.msk.bf16.vlgmr.msra.gmra.mrb[8].mxu1 %vm2075_vm4, %v6111_v49 }
 0x294   :  { %4390 = vmatpush3.bf16.msra.mxu1 %v2715_v12  ;;  %4377 = vmatprep.mubr.msk.bf16.mxu1 %vm2075_vm4, %v6116_v34  ;;  %v6135_v12 = vpack.c.bf16 %v6011_v39, %v6018_v31 }
 0x295   :  { %4803 = vmatprep.subr.msk.bf16.mxu1 %vm2273_vm7, %v3949_v3  ;;  %v2685_v3 = vpack.c.bf16 %v2210_v14, %v2209_v25 }
 0x29b   :  { %4378 = vmatmul.mubr.msk.bf16.gmra.mrb[12].mxu1 %vm2075_vm4, %v6127_v47  ;;  %v2682_v47 = vpack.c.bf16 %v2204_v33, %v6074_v9  ;;  %v2686_v9 = vpack.c.bf16 %v2212_v17, %v2211_v41  ;;  %v6490_v33 = vpack.c.bf16 %v5927_v50, %v5923_v10  ;;  %v6493_v10 = vpack.c.bf16 %v6009_v53, %v6005_v24  ;;  %v3976_v24 = vld [vmem:[%s6390_s6 + $0x1c] sm:$0xf]  ;;  %v3669_v41 = vld [vmem:[%s6393_s7] sm:$0x3]  ;;  %v6504_v17 = vld [vmem:[#allocation6_spill] sm:$0xff] }
 0x29c   :  { %4381 = vmatprep.mubr.msk.bf16.mxu1 %vm2075_vm4, %v2518_v11  ;;  %v2680_v11 = vpack.c.bf16 %v2200_v37, %v6050_v23  ;;  %v2671_v23 = vld [vmem:[#allocation4 + $0x80] sm:$0xff]  ;;  %v6494_v50 = vpack.c.bf16 %v6052_v42, %v6044_v16  ;;  %v6496_v53 = vpack.c.bf16 %v5931_v54, %v5929_v5  ;;  %v6498_v16 = vpack.c.bf16 %v6018_v31, %v6032_v15 }
 0x29d   :  { %v2683_v37 = vpack.c.bf16 %v2671_v23, %v2205_v19  ;;  %v6499_v5 = vpack.c.bf16 %v6013_v59, %v6011_v39  ;;  %v6500_v54 = vpack.c.bf16 %v6056_v26, %v6064_v63  ;;  %v3380_v31 = vsel %vm2273_vm7, %v3976_v24, 0  ;;  %v3985_v39 = vld [vmem:[%s6390_s6 + $0x20] sm:$0xf]  ;;  %v3170_v59 = vld [vmem:[#allocation4 + $0x90] sm:$0xff] }
 0x29e   :  { %v3182_v15 = vpack.c.bf16 %v3170_v59, %v2671_v23 }
 0x2a3   :  { %4382 = vmatmul.mubr.msk.bf16.gmra.mrb[0].mxu1 %vm2075_vm4, %v6135_v12 }
 0x2a4   :  { %4385 = vmatprep.mubr.msk.bf16.mxu1 %vm2075_vm4, %v6139_v56  ;;  %v3958_v56 = vld [vmem:[%s6390_s6 + $0x14] sm:$0xf] }
 0x2a5   :  { %v3047_v57 = vsel %vm2273_vm7, %v3958_v56, 0 }
 0x2ab   :  { %4386 = vmatmul.mubr.msk.bf16.gmra.mrb[4].mxu1 %vm2075_vm4, %v6146_v40  ;;  %v2684_v40 = vpack.c.bf16 %v2208_v35, %v2207_v18 }
 0x2ac   :  { %4391 = vmatprep.mubr.msk.bf16.mxu1 %vm2075_vm4, %v2680_v11  ;;  %v6507_v11 = vld [vmem:[#allocation9_spill] sm:$0xff] }
 0x2b3   :  { %4392 = vmatmul.mubr.msk.bf16.vlgmr.msra.gmra.mrb[8].mxu1 %vm2075_vm4, %v2681_v44  ;;  %v2687_v44 = vpack.c.bf16 %v2679_v51, %v2213_v27  ;;  %v6491_v27 = vpack.c.bf16 %v5974_v13, %v5965_v7  ;;  %v2845_v7 = vld [vmem:[#allocation4 + $0x121] sm:$0xff] }
 0x2b4   :  { %4408 = vmatpush3.bf16.msra.mxu1 %v2881_v32  ;;  %4395 = vmatprep.mubr.msk.bf16.mxu1 %vm2075_vm4, %v2682_v47  ;;  %v6489_v32 = vpack.c.bf16 %v5935_v45, %v5921_v58  ;;  %v2837_v58 = vld [vmem:[#allocation4 + $0x81] sm:$0xff]  ;;  %v2853_v13 = vpack.c.bf16 %v2845_v7, %v6054_v43  ;;  %v3178_v43 = vld [vmem:[#allocation4 + $0x130] sm:$0xff] }
 0x2b5   :  { %4804 = vmatprep.subr.msk.bf16.mxu1 %vm2273_vm7, %v3958_v56  ;;  %v2849_v45 = vpack.c.bf16 %v2837_v58, %v5976_v0  ;;  %v6492_v56 = vpack.c.bf16 %v6016_v30, %v6003_v22  ;;  %v6495_v0 = vpack.c.bf16 %v5937_v8, %v5952_v48  ;;  %v6497_v30 = vpack.c.bf16 %v5978_v60, %v5990_v62  ;;  %v3003_v8 = vld [vmem:[#allocation4 + $0x82] sm:$0xff] }
 0x2b6   :  { %v3015_v48 = vpack.c.bf16 %v3003_v8, %v2505_v1  ;;  %v3011_v60 = vld [vmem:[#allocation4 + $0x122] sm:$0xff] }
 0x2b7   :  { %v3019_v62 = vpack.c.bf16 %v3011_v60, %v2513_v46  ;;  %v6506_v46 = vld [vmem:[#allocation10_spill] sm:$0xff] }
 0x2b8   :  { %v3663_v23 = vpack.c.bf16 %v6507_v11, %v6506_v46 }
 0x2bb   :  { %4396 = vmatmul.mubr.msk.bf16.gmra.mrb[12].mxu1 %vm2075_vm4, %v2683_v37  ;;  %v6508_v37 = vld [vmem:[#allocation7_spill] sm:$0xff] }
 0x2bc   :  { %4399 = vmatprep.mubr.msk.bf16.mxu1 %vm2075_vm4, %v2684_v40  ;;  %v3967_v40 = vld [vmem:[%s6390_s6 + $0x18] sm:$0xf] }
 0x2bd   :  { %v3214_v22 = vsel %vm2273_vm7, %v3967_v40, 0 }
 0x2c3   :  { %4400 = vmatmul.mubr.msk.bf16.gmra.mrb[0].mxu1 %vm2075_vm4, %v2685_v3 }
 0x2c4   :  { %4403 = vmatprep.mubr.msk.bf16.mxu1 %vm2075_vm4, %v2686_v9  ;;  %v6511_v9 = vld [vmem:[#allocation12_spill] sm:$0xff] }
 0x2cb   :  { %4404 = vmatmul.mubr.msk.bf16.gmra.mrb[4].mxu1 %vm2075_vm4, %v2687_v44 }
 0x2cc   :  { %4409 = vmatprep.mubr.msk.bf16.mxu1 %vm2075_vm4, %v6489_v32  ;;  %v6513_v32 = vld [vmem:[#allocation14_spill] sm:$0xff] }
 0x2d3   :  { %4410 = vmatmul.mubr.msk.bf16.vlgmr.msra.gmra.mrb[8].mxu1 %vm2075_vm4, %v6490_v33  ;;  %v6515_v33 = vld [vmem:[#allocation16_spill] sm:$0xff] }
 0x2d4   :  { %4426 = vmatpush3.bf16.msra.mxu1 %v3047_v57  ;;  %4413 = vmatprep.mubr.msk.bf16.mxu1 %vm2075_vm4, %v6491_v27  ;;  %v6514_v57 = vld [vmem:[#allocation13_spill] sm:$0xff]  ;;  %v6516_v27 = vld [vmem:[#allocation15_spill] sm:$0xff] }
 0x2d5   :  { %4805 = vmatprep.subr.msk.bf16.mxu1 %vm2273_vm7, %v3967_v40  ;;  %v3665_v40 = vpack.c.bf16 %v6514_v57, %v6513_v32 }
 0x2db   :  { %4414 = vmatmul.mubr.msk.bf16.gmra.mrb[12].mxu1 %vm2075_vm4, %v2849_v45  ;;  %v6517_v45 = vld [vmem:[#allocation18_spill] sm:$0xff] }
 0x2dc   :  { %4417 = vmatprep.mubr.msk.bf16.mxu1 %vm2075_vm4, %v6492_v56  ;;  %v6518_v56 = vld [vmem:[#allocation17_spill] sm:$0xff] }
 0x2e3   :  { %4418 = vmatmul.mubr.msk.bf16.gmra.mrb[0].mxu1 %vm2075_vm4, %v6493_v10  ;;  %v3667_v10 = vpack.c.bf16 %v6518_v56, %v6517_v45 }
 0x2e4   :  { %4421 = vmatprep.mubr.msk.bf16.mxu1 %vm2075_vm4, %v6494_v50  ;;  %v6519_v50 = vld [vmem:[#allocation20_spill] sm:$0xff] }
 0x2eb   :  { %4422 = vmatmul.mubr.msk.bf16.gmra.mrb[4].mxu1 %vm2075_vm4, %v2853_v13 }
 0x2ec   :  { %4427 = vmatprep.mubr.msk.bf16.mxu1 %vm2075_vm4, %v6495_v0 }
 0x2f3   :  { %4428 = vmatmul.mubr.msk.bf16.vlgmr.msra.gmra.mrb[8].mxu1 %vm2075_vm4, %v6496_v53 }
 0x2f4   :  { %4444 = vmatpush3.bf16.msra.mxu1 %v3214_v22  ;;  %4431 = vmatprep.mubr.msk.bf16.mxu1 %vm2075_vm4, %v6497_v30 }
 0x2f5   :  { %4806 = vmatprep.subr.msk.bf16.mxu1 %vm2273_vm7, %v3976_v24 }
 0x2fb   :  { %4432 = vmatmul.mubr.msk.bf16.gmra.mrb[12].mxu1 %vm2075_vm4, %v3015_v48 }
 0x2fc   :  { %4435 = vmatprep.mubr.msk.bf16.mxu1 %vm2075_vm4, %v6498_v16 }
 0x303   :  { %4436 = vmatmul.mubr.msk.bf16.gmra.mrb[0].mxu1 %vm2075_vm4, %v6499_v5 }
 0x304   :  { %4439 = vmatprep.mubr.msk.bf16.mxu1 %vm2075_vm4, %v6500_v54 }
 0x30b   :  { %4440 = vmatmul.mubr.msk.bf16.gmra.mrb[4].mxu1 %vm2075_vm4, %v3019_v62 }
 0x30c   :  { %4445 = vmatprep.mubr.msk.bf16.mxu1 %vm2075_vm4, %v6076_v6 }
 0x313   :  { %4446 = vmatmul.mubr.msk.bf16.vlgmr.msra.gmra.mrb[8].mxu1 %vm2075_vm4, %v6080_v55  ;;  %v3186_v55 = vpack.c.bf16 %v3178_v43, %v2679_v51  ;;  %v6512_v51 = vld [vmem:[#allocation11_spill] sm:$0xff] }
 0x314   :  { %4462 = vmatpush3.bf16.msra.mxu1 %v3380_v31  ;;  %4449 = vmatprep.mubr.msk.bf16.mxu1 %vm2075_vm4, %v6090_v20  ;;  %v3664_v44 = vpack.c.bf16 %v6512_v51, %v6511_v9 }
 0x315   :  { %4807 = vmatprep.subr.msk.bf16.mxu1 %vm2273_vm7, %v3985_v39 }
 0x31b   :  { %4450 = vmatmul.mubr.msk.bf16.gmra.mrb[12].mxu1 %vm2075_vm4, %v3182_v15 }
 0x31c   :  { %4453 = vmatprep.mubr.msk.bf16.mxu1 %vm2075_vm4, %v6095_v29 }
 0x323   :  { %4454 = vmatmul.mubr.msk.bf16.gmra.mrb[0].mxu1 %vm2075_vm4, %v6097_v28  ;;  %v3510_v28 = vld [vmem:[#allocation4 + $0x132] sm:$0xff] }
 0x324   :  { %4457 = vmatprep.mubr.msk.bf16.mxu1 %vm2075_vm4, %v6103_v38  ;;  %v3546_v38 = vsel %vm2273_vm7, %v3985_v39, 0  ;;  %v3518_v47 = vpack.c.bf16 %v3510_v28, %v3011_v60 }
 0x326   :  { %v4339_v42 = vpop.f32.mrb[16].mxu0 }
 0x327   :  { %v2311_v26 = vpop.f32.mrb[17].mxu0 }
 0x328   :  { %v4340_v63 = vpop.f32.mrb[18].mxu0 }
 0x329   :  { %v6247_v6 = vpop.f32.mrb[19].mxu0 }
 0x32b   :  { %4458 = vmatmul.mubr.msk.bf16.gmra.mrb[4].mxu1 %vm2075_vm4, %v3186_v55 }
 0x32c   :  { %4463 = vmatprep.mubr.msk.bf16.mxu1 %vm2075_vm4, %v5948_v61  ;;  %v3336_v61 = vld [vmem:[#allocation4 + $0x91] sm:$0xff] }
 0x32d   :  { %v3348_v25 = vpack.c.bf16 %v3336_v61, %v2837_v58  ;;  %v3666_v58 = vpack.c.bf16 %v6516_v27, %v6515_v33 }
 0x32e   :  { %v6252_v18 = vpop.f32.mrb[20].mxu0 }
 0x32f   :  { %v6254_v19 = vpop.f32.mrb[21].mxu0 }
 0x330   :  { %v6256_v20 = vpop.f32.mrb[22].mxu0 }
 0x331   :  { %v6258_v35 = vpop.f32.mrb[23].mxu0 }
 0x333   :  { %4464 = vmatmul.mubr.msk.bf16.vlgmr.msra.gmra.mrb[8].mxu1 %vm2075_vm4, %v5970_v4  ;;  %v3344_v4 = vld [vmem:[#allocation4 + $0x131] sm:$0xff] }
 0x334   :  { %4480 = vmatpush3.bf16.msra.mxu1 %v3546_v38  ;;  %4467 = vmatprep.mubr.msk.bf16.mxu1 %vm2075_vm4, %v5986_v52  ;;  %v3352_v29 = vpack.c.bf16 %v3344_v4, %v2845_v7  ;;  %v3695_v52 = vsel %vm595_vm2, %v3669_v41, 0  ;;  %v6520_v7 = vld [vmem:[#allocation19_spill] sm:$0xff] }
 0x335   :  { %4808 = vmatprep.subr.msk.bf16.mxu1 %vm595_vm2, %v3669_v41  ;;  %v3668_v13 = vpack.c.bf16 %v6520_v7, %v6519_v50 }
 0x33b   :  { %4468 = vmatmul.mubr.msk.bf16.gmra.mrb[12].mxu1 %vm2075_vm4, %v3348_v25 }
 0x33c   :  { %4471 = vmatprep.mubr.msk.bf16.mxu1 %vm2075_vm4, %v6028_v2  ;;  %v6501_v2 = vld [vmem:[#allocation23_spill] sm:$0xff] }
 0x343   :  { %4472 = vmatmul.mubr.msk.bf16.gmra.mrb[0].mxu1 %vm2075_vm4, %v6048_v21  ;;  %v3502_v21 = vld [vmem:[#allocation4 + $0x92] sm:$0xff] }
 0x344   :  { %4475 = vmatprep.mubr.msk.bf16.mxu1 %vm2075_vm4, %v6062_v36  ;;  %v3514_v14 = vpack.c.bf16 %v3502_v21, %v3003_v8  ;;  %v6502_v36 = vld [vmem:[#allocation22_spill] sm:$0xff] }
 0x34b   :  { %4476 = vmatmul.mubr.msk.bf16.gmra.mrb[4].mxu1 %vm2075_vm4, %v3352_v29 }
 0x34c   :  { %4481 = vmatprep.mubr.msk.bf16.mxu1 %vm2075_vm4, %v6111_v49  ;;  %v6503_v49 = vld [vmem:[#allocation21_spill] sm:$0xff] }
 0x353   :  { %4482 = vmatmul.mubr.msk.bf16.vlgmr.msra.gmra.mrb[8].mxu1 %vm2075_vm4, %v6116_v34  ;;  %v6505_v34 = vld [vmem:[#allocation5_spill] sm:$0xff] }
 0x354   :  { %4498 = vmatpush3.bf16.msra.mxu1 %v3695_v52  ;;  %4485 = vmatprep.mubr.msk.bf16.mxu1 %vm2075_vm4, %v6501_v2  ;;  %v3661_v1 = vpack.c.bf16 %v6505_v34, %v6504_v17 }
 0x35b   :  { %4486 = vmatmul.mubr.msk.bf16.gmra.mrb[12].mxu1 %vm2075_vm4, %v3514_v14 }
 0x35c   :  { %4489 = vmatprep.mubr.msk.bf16.mxu1 %vm2075_vm4, %v6135_v12  ;;  %v6509_v12 = vld [vmem:[#allocation8_spill] sm:$0xff] }
 0x35d   :  { %v6510_v3 = vpack.c.bf16 %v6508_v37, %v6509_v12 }
 0x363   :  { %4490 = vmatmul.mubr.msk.bf16.gmra.mrb[0].mxu1 %vm2075_vm4, %v6502_v36 }
 0x364   :  { %4493 = vmatprep.mubr.msk.bf16.mxu1 %vm2075_vm4, %v6503_v49 }
 0x36b   :  { %4494 = vmatmul.mubr.msk.bf16.gmra.mrb[4].mxu1 %vm2075_vm4, %v3518_v47 }
 0x36c   :  { %4499 = vmatprep.mubr.msk.bf16.mxu1 %vm172_vm0, %v3661_v1 }
 0x373   :  { %4500 = vmatmul.mubr.msk.bf16.vlgmr.msra.gmra.mrb[8].mxu1 %vm172_vm0, %v6510_v3 }
 0x374   :  { %4503 = vmatprep.mubr.msk.bf16.mxu1 %vm172_vm0, %v3663_v23 }
 0x37b   :  { %4504 = vmatmul.mubr.msk.bf16.gmra.mrb[12].mxu1 %vm172_vm0, %v3664_v44 }
 0x37c   :  { %4507 = vmatprep.mubr.msk.bf16.mxu1 %vm172_vm0, %v3665_v40 }
 0x383   :  { %4508 = vmatmul.mubr.msk.bf16.gmra.mrb[0].mxu1 %vm172_vm0, %v3666_v58 }
 0x384   :  { %4511 = vmatprep.mubr.msk.bf16.mxu1 %vm172_vm0, %v3667_v10 }
 0x38b   :  { %4512 = vmatmul.mubr.msk.bf16.gmra.mrb[4].mxu1 %vm172_vm0, %v3668_v13 }
 0x446   :  { %v4501_v0 = vpop.f32.mrb[8].mxu1 }
 0x447   :  { %v4517_v22 = vadd.f32 %v4501_v0, %v4339_v42  ;;  %v3731_v24 = vpop.f32.mrb[9].mxu1 }
 0x448   :  { %v4518_v53 = vadd.f32 %v3731_v24, %v2311_v26  ;;  %v4502_v30 = vpop.f32.mrb[10].mxu1 }
 0x449   :  { %3812 = vst.msk [vmem:[%s6394_s8 + $0x10] sm:$0xff] %vm2075_vm4, %v4517_v22  ;;  %v4519_v8 = vadd.f32 %v4502_v30, %v4340_v63  ;;  %v3734_v48 = vpop.f32.mrb[11].mxu1 }
 0x44a   :  { %3810 = vst.msk [vmem:[%s6394_s8] sm:$0xff] %vm2075_vm4, %v4518_v53  ;;  %v4520_v16 = vadd.f32 %v3734_v48, %v6247_v6 }
 0x44b   :  { %3813 = vst.msk [vmem:[%s6394_s8 + $0x18] sm:$0xff] %vm2075_vm4, %v4519_v8 }
 0x44c   :  { %3811 = vst.msk [vmem:[%s6394_s8 + $0x8] sm:$0xff] %vm2075_vm4, %v4520_v16 }
 0x44e   :  { %v4505_v5 = vpop.f32.mrb[12].mxu1 }
 0x44f   :  { %v4521_v54 = vadd.f32 %v4505_v5, %v6252_v18  ;;  %v3747_v60 = vpop.f32.mrb[13].mxu1 }
 0x450   :  { %v4522_v62 = vadd.f32 %v3747_v60, %v6254_v19  ;;  %v4506_v31 = vpop.f32.mrb[14].mxu1 }
 0x451   :  { %3816 = vst.msk [vmem:[%s6394_s8 + $0x30] sm:$0xff] %vm2075_vm4, %v4521_v54  ;;  %v4523_v39 = vadd.f32 %v4506_v31, %v6256_v20  ;;  %v3750_v59 = vpop.f32.mrb[15].mxu1 }
 0x452   :  { %3814 = vst.msk [vmem:[%s6394_s8 + $0x20] sm:$0xff] %vm2075_vm4, %v4522_v62  ;;  %v4524_v15 = vadd.f32 %v3750_v59, %v6258_v35 }
 0x453   :  { %3817 = vst.msk [vmem:[%s6394_s8 + $0x38] sm:$0xff] %vm2075_vm4, %v4523_v39 }
 0x454   :  { %3815 = vst.msk [vmem:[%s6394_s8 + $0x28] sm:$0xff] %vm2075_vm4, %v4524_v15 }
 0x456   :  { %v4509_v42 = vpop.f32.mrb[0].mxu1 }
 0x457   :  { %3820 = vst.msk [vmem:[%s6394_s8 + $0x50] sm:$0xff] %vm2075_vm4, %v4509_v42  ;;  %v3763_v43 = vpop.f32.mrb[1].mxu1 }
 0x458   :  { %3818 = vst.msk [vmem:[%s6394_s8 + $0x40] sm:$0xff] %vm2075_vm4, %v3763_v43  ;;  %v4510_v26 = vpop.f32.mrb[2].mxu1 }
 0x459   :  { %3821 = vst.msk [vmem:[%s6394_s8 + $0x58] sm:$0xff] %vm2075_vm4, %v4510_v26  ;;  %v3766_v63 = vpop.f32.mrb[3].mxu1 }
 0x45a   :  { %3819 = vst.msk [vmem:[%s6394_s8 + $0x48] sm:$0xff] %vm2075_vm4, %v3766_v63 }
 0x45e   :  { %v4513_v6 = vpop.f32.mrb[4].mxu1 }
 0x45f   :  { %3824 = vst.msk [vmem:[%s6394_s8 + $0x70] sm:$0xff] %vm2075_vm4, %v4513_v6  ;;  %v3779_v55 = vpop.f32.mrb[5].mxu1 }
 0x460   :  { %3822 = vst.msk [vmem:[%s6394_s8 + $0x60] sm:$0xff] %vm2075_vm4, %v3779_v55  ;;  %v4514_v18 = vpop.f32.mrb[6].mxu1 }
 0x461   :  { %3825 = vst.msk [vmem:[%s6394_s8 + $0x78] sm:$0xff] %vm2075_vm4, %v4514_v18  ;;  %v3782_v19 = vpop.f32.mrb[7].mxu1 }
 0x462   :  { %3823 = vst.msk [vmem:[%s6394_s8 + $0x68] sm:$0xff] %vm2075_vm4, %v3782_v19 }

</bundles_post_ra>
